<compile_context>
chip_gen: v5e
topology: v5e:2x2
jax: 0.10.0
libtpu: 0.0.40
codegen_flags: <defaults>
</compile_context>

<pallas_src>
import jax
import jax.numpy as jnp
from jax.experimental import pallas as pl
from jax.experimental.pallas import tpu as pltpu


def _attention_kernel(h_ref, enc_ref, wh_ref, we_ref, b_ref, v_ref, out_ref):
    h = h_ref[...]       # [B, Dd]
    enc = enc_ref[...]   # [S, B, E2]   seq-major, exactly as stored in HBM
    wh = wh_ref[...]     # [Do, Dd]     PyTorch attn_fc weight, hidden half
    we = we_ref[...]     # [Do, E2]     PyTorch attn_fc weight, encoder half
    b = b_ref[...]       # [Do, 1]      attn_fc bias (column vector)
    v = v_ref[...]       # [1, Do]      v_fc weight (no bias)

    S, B, E2 = enc.shape
    Do, Dd = wh.shape

    # --- hidden projection with the bias folded in (VPU; K=Dd=4 is far too
    # small to feed the MXU).  ehb[o, b] = bias[o] + sum_d wh[o,d]*hidden[b,d]
    h_t = h.T                                            # [Dd, B]  tiny 2-D transpose
    ehb = b                                              # [Do, 1] -> broadcasts over B
    for d in range(Dd):                                  # unrolled rank-1 accumulate
        ehb = ehb + wh[:, d:d + 1] * h_t[d:d + 1, :]     # [Do, B]

    # --- encoder projection + tanh + v_fc, fused and unrolled over the Do
    # energy channels.  Each intermediate is one [S, B] tile (a single vreg at
    # these shapes).  NOTE: in a real decoder loop the encoder-side term
    # (enc . We) is invariant across decode steps and could be precomputed
    # once per sequence outside this kernel; kept here to preserve the
    # module's standalone forward semantics.
    att_sb = jnp.zeros((S, B), jnp.float32)
    for o in range(Do):
        we_row = we[o:o + 1, :].reshape(1, 1, E2)        # [1, 1, E2]
        ee_o = jnp.sum(enc * we_row, axis=2)             # [S, B]  VPU mul + lane reduce
        energy_o = jnp.tanh(ee_o + ehb[o:o + 1, :])      # [S, B]  EUP tanh
        att_sb = att_sb + v[0:1, o:o + 1] * energy_o     # v_fc accumulate

    # --- softmax over src_len (PyTorch dim=1), in batch-major layout
    att = att_sb.T                                       # [B, S]  tiny 2-D transpose
    m = jnp.max(att, axis=1, keepdims=True)
    e = jnp.exp(att - m)
    denom = jnp.sum(e, axis=1, keepdims=True)
    r = pl.reciprocal(denom, approx=True)                # EUP slot (not VALU)
    r = r * (2.0 - denom * r)                            # one Newton step -> f32 accuracy
    out_ref[...] = (e * r).astype(out_ref.dtype)


def attention_forward(hidden, encoder_outputs, w_attn, b_attn, w_v):
    """
    hidden:          [B, Dd]           float32
    encoder_outputs: [S, B, 2*De]      float32   (PyTorch seq-major layout; NOT transposed)
    w_attn:          [Do, 2*De + Dd]   PyTorch nn.Linear weight (concat order: hidden, enc)
    b_attn:          [Do]
    w_v:             [1, Do]           PyTorch nn.Linear weight, no bias
    returns:         [B, S] softmax attention weights
    """
    B, Dd = hidden.shape
    S, _, E2 = encoder_outputs.shape
    Do = w_attn.shape[0]

    # Only tiny parameter views here (a few hundred bytes, one-time); the large
    # encoder_outputs tensor is passed through untouched (no HBM transpose).
    wh = w_attn[:, :Dd]          # [Do, Dd]  hidden half of the concat
    we = w_attn[:, Dd:]          # [Do, E2]  encoder half of the concat
    b2 = b_attn.reshape(Do, 1)   # [Do, 1]
    v2 = w_v.reshape(1, Do)      # [1, Do]

    # Whole problem in a single grid step: no per-step pipeline overhead and no
    # batch-divisibility requirement.  If shapes scale up (real S/E2/B), tile
    # the batch axis with a "parallel" grid dim (2-TC split on v7x) and
    # re-check the block against VMEM (v7x: 64 MiB physical / 32 MiB scoped).
    return pl.pallas_call(
        _attention_kernel,
        out_shape=jax.ShapeDtypeStruct((B, S), jnp.float32),
        grid_spec=pltpu.PrefetchScalarGridSpec(
            num_scalar_prefetch=0,
            grid=(1,),
            in_specs=[
                pl.BlockSpec((B, Dd), lambda i: (0, 0)),
                pl.BlockSpec((S, B, E2), lambda i: (0, 0, 0)),
                pl.BlockSpec((Do, Dd), lambda i: (0, 0)),
                pl.BlockSpec((Do, E2), lambda i: (0, 0)),
                pl.BlockSpec((Do, 1), lambda i: (0, 0)),
                pl.BlockSpec((1, Do), lambda i: (0, 0)),
            ],
            out_specs=pl.BlockSpec((B, S), lambda i: (0, 0)),
        ),
        compiler_params=pltpu.CompilerParams(
            dimension_semantics=("arbitrary",),
        ),
    )(hidden, encoder_outputs, wh, we, b2, v2)


def _reference(hidden, encoder_outputs, w_attn, b_attn, w_v):
    """Pure-JAX transcription of the PyTorch forward for correctness checking."""
    S, B, _ = encoder_outputs.shape
    h_rep = jnp.repeat(hidden[:, None, :], S, axis=1)                 # [B, S, Dd]
    enc = jnp.transpose(encoder_outputs, (1, 0, 2))                   # [B, S, E2]
    x = jnp.concatenate([h_rep, enc], axis=2)                         # [B, S, Dd+E2]
    energy = jnp.tanh(x @ w_attn.T + b_attn)                          # [B, S, Do]
    att = (energy @ w_v.T)[..., 0]                                    # [B, S]
    return jax.nn.softmax(att, axis=1)


if __name__ == "__main__":
    # module hyperparameters (from the PyTorch snippet)
    encoder_hidden_dim = 4
    decoder_hidden_dim = 4
    batch_size = 32
    src_length = 8

    in_dim = encoder_hidden_dim * 2 + decoder_hidden_dim   # 12
    out_dim = decoder_hidden_dim                            # 4

    key = jax.random.PRNGKey(0)
    k1, k2, k3, k4, k5 = jax.random.split(key, 5)

    # deterministic parameter init (uniform, PyTorch-Linear-like scale)
    w_attn = jax.random.uniform(k1, (out_dim, in_dim), jnp.float32, -0.5, 0.5)
    b_attn = jax.random.uniform(k2, (out_dim,), jnp.float32, -0.5, 0.5)
    w_v = jax.random.uniform(k3, (1, out_dim), jnp.float32, -0.5, 0.5)

    # inputs: hidden [B, Dd], encoder_outputs [S, B, 2*De]
    hidden = jax.random.normal(k4, (batch_size, decoder_hidden_dim), jnp.float32)
    encoder_outputs = jax.random.normal(
        k5, (src_length, batch_size, encoder_hidden_dim * 2), jnp.float32
    )

    out = attention_forward(hidden, encoder_outputs, w_attn, b_attn, w_v)
    out = jax.block_until_ready(out)

    ref = _reference(hidden, encoder_outputs, w_attn, b_attn, w_v)
    assert out.shape == (batch_size, src_length)
    err = float(jnp.max(jnp.abs(out - ref)))
    assert jnp.allclose(out, ref, atol=1e-5, rtol=1e-5), err

    print("KERNEL_OK")
</pallas_src>

<mosaic_0001>
module attributes {stable_mosaic.version = 11 : i64} {
  func.func @_attention_kernel(%arg0: i32, %arg1: memref<32x4xf32, #tpu.memory_space<vmem>>, %arg2: memref<8x32x8xf32, #tpu.memory_space<vmem>>, %arg3: memref<4x4xf32, #tpu.memory_space<vmem>>, %arg4: memref<4x8xf32, #tpu.memory_space<vmem>>, %arg5: memref<4x1xf32, #tpu.memory_space<vmem>>, %arg6: memref<1x4xf32, #tpu.memory_space<vmem>>, %arg7: memref<32x8xf32, #tpu.memory_space<vmem>>) attributes {dimension_semantics = [#tpu.dimension_semantics<arbitrary>], iteration_bounds = array<i64: 1>, scalar_prefetch = 0 : i64, scratch_operands = 0 : i64, tpu.core_type = #tpu.core_type<tc>, window_params = [{pipeline_mode = #tpu.pipeline_mode<synchronous>, transform_indices = @transform_0, window_bounds = array<i64: 32, 4>}, {pipeline_mode = #tpu.pipeline_mode<synchronous>, transform_indices = @transform_1, window_bounds = array<i64: 8, 32, 8>}, {pipeline_mode = #tpu.pipeline_mode<synchronous>, transform_indices = @transform_2, window_bounds = array<i64: 4, 4>}, {pipeline_mode = #tpu.pipeline_mode<synchronous>, transform_indices = @transform_3, window_bounds = array<i64: 4, 8>}, {pipeline_mode = #tpu.pipeline_mode<synchronous>, transform_indices = @transform_4, window_bounds = array<i64: 4, 1>}, {pipeline_mode = #tpu.pipeline_mode<synchronous>, transform_indices = @transform_5, window_bounds = array<i64: 1, 4>}, {pipeline_mode = #tpu.pipeline_mode<synchronous>, transform_indices = @transform_6, window_bounds = array<i64: 32, 8>}]} {
    %c0 = arith.constant 0 : index
    %c0_0 = arith.constant 0 : index
    %0 = vector.load %arg1[%c0, %c0_0] : memref<32x4xf32, #tpu.memory_space<vmem>>, vector<32x4xf32>
    %c0_1 = arith.constant 0 : index
    %c0_2 = arith.constant 0 : index
    %c0_3 = arith.constant 0 : index
    %1 = vector.load %arg2[%c0_1, %c0_2, %c0_3] : memref<8x32x8xf32, #tpu.memory_space<vmem>>, vector<8x32x8xf32>
    %c0_4 = arith.constant 0 : index
    %c0_5 = arith.constant 0 : index
    %2 = vector.load %arg3[%c0_4, %c0_5] : memref<4x4xf32, #tpu.memory_space<vmem>>, vector<4x4xf32>
    %c0_6 = arith.constant 0 : index
    %c0_7 = arith.constant 0 : index
    %3 = vector.load %arg4[%c0_6, %c0_7] : memref<4x8xf32, #tpu.memory_space<vmem>>, vector<4x8xf32>
    %c0_8 = arith.constant 0 : index
    %c0_9 = arith.constant 0 : index
    %4 = vector.load %arg5[%c0_8, %c0_9] : memref<4x1xf32, #tpu.memory_space<vmem>>, vector<4x1xf32>
    %c0_10 = arith.constant 0 : index
    %c0_11 = arith.constant 0 : index
    %5 = vector.load %arg6[%c0_10, %c0_11] : memref<1x4xf32, #tpu.memory_space<vmem>>, vector<1x4xf32>
    %6 = tpu.transpose %0, [1, 0] : vector<32x4xf32> -> vector<4x32xf32>
    %7 = vector.extract_strided_slice %2 {offsets = [0, 0], sizes = [4, 1], strides = [1, 1]} : vector<4x4xf32> to vector<4x1xf32>
    %8 = vector.extract_strided_slice %6 {offsets = [0, 0], sizes = [1, 32], strides = [1, 1]} : vector<4x32xf32> to vector<1x32xf32>
    %9 = vector.broadcast %7 : vector<4x1xf32> to vector<4x32xf32>
    %10 = vector.broadcast %8 : vector<1x32xf32> to vector<4x32xf32>
    %11 = arith.mulf %9, %10 : vector<4x32xf32>
    %12 = vector.broadcast %4 : vector<4x1xf32> to vector<4x32xf32>
    %13 = arith.addf %12, %11 : vector<4x32xf32>
    %14 = vector.extract_strided_slice %2 {offsets = [0, 1], sizes = [4, 1], strides = [1, 1]} : vector<4x4xf32> to vector<4x1xf32>
    %15 = vector.extract_strided_slice %6 {offsets = [1, 0], sizes = [1, 32], strides = [1, 1]} : vector<4x32xf32> to vector<1x32xf32>
    %16 = vector.broadcast %14 : vector<4x1xf32> to vector<4x32xf32>
    %17 = vector.broadcast %15 : vector<1x32xf32> to vector<4x32xf32>
    %18 = arith.mulf %16, %17 : vector<4x32xf32>
    %19 = arith.addf %13, %18 : vector<4x32xf32>
    %20 = vector.extract_strided_slice %2 {offsets = [0, 2], sizes = [4, 1], strides = [1, 1]} : vector<4x4xf32> to vector<4x1xf32>
    %21 = vector.extract_strided_slice %6 {offsets = [2, 0], sizes = [1, 32], strides = [1, 1]} : vector<4x32xf32> to vector<1x32xf32>
    %22 = vector.broadcast %20 : vector<4x1xf32> to vector<4x32xf32>
    %23 = vector.broadcast %21 : vector<1x32xf32> to vector<4x32xf32>
    %24 = arith.mulf %22, %23 : vector<4x32xf32>
    %25 = arith.addf %19, %24 : vector<4x32xf32>
    %26 = vector.extract_strided_slice %2 {offsets = [0, 3], sizes = [4, 1], strides = [1, 1]} : vector<4x4xf32> to vector<4x1xf32>
    %27 = vector.extract_strided_slice %6 {offsets = [3, 0], sizes = [1, 32], strides = [1, 1]} : vector<4x32xf32> to vector<1x32xf32>
    %28 = vector.broadcast %26 : vector<4x1xf32> to vector<4x32xf32>
    %29 = vector.broadcast %27 : vector<1x32xf32> to vector<4x32xf32>
    %30 = arith.mulf %28, %29 : vector<4x32xf32>
    %31 = arith.addf %25, %30 : vector<4x32xf32>
    %cst = arith.constant 0.000000e+00 : f32
    %32 = vector.broadcast %cst : f32 to vector<8x32xf32>
    %33 = vector.extract_strided_slice %3 {offsets = [0, 0], sizes = [1, 8], strides = [1, 1]} : vector<4x8xf32> to vector<1x8xf32>
    %34 = vector.shape_cast %33 : vector<1x8xf32> to vector<1x1x8xf32>
    %35 = vector.broadcast %34 : vector<1x1x8xf32> to vector<8x32x8xf32>
    %36 = arith.mulf %1, %35 : vector<8x32x8xf32>
    %cst_12 = arith.constant dense<0.000000e+00> : vector<8x32xf32>
    %37 = vector.multi_reduction <add>, %36, %cst_12 [2] : vector<8x32x8xf32> to vector<8x32xf32>
    %38 = vector.extract_strided_slice %31 {offsets = [0, 0], sizes = [1, 32], strides = [1, 1]} : vector<4x32xf32> to vector<1x32xf32>
    %39 = vector.broadcast %38 : vector<1x32xf32> to vector<8x32xf32>
    %40 = arith.addf %37, %39 : vector<8x32xf32>
    %41 = math.tanh %40 : vector<8x32xf32>
    %42 = vector.extract_strided_slice %5 {offsets = [0, 0], sizes = [1, 1], strides = [1, 1]} : vector<1x4xf32> to vector<1x1xf32>
    %43 = vector.broadcast %42 : vector<1x1xf32> to vector<8x32xf32>
    %44 = arith.mulf %43, %41 : vector<8x32xf32>
    %45 = arith.addf %32, %44 : vector<8x32xf32>
    %46 = vector.extract_strided_slice %3 {offsets = [1, 0], sizes = [1, 8], strides = [1, 1]} : vector<4x8xf32> to vector<1x8xf32>
    %47 = vector.shape_cast %46 : vector<1x8xf32> to vector<1x1x8xf32>
    %48 = vector.broadcast %47 : vector<1x1x8xf32> to vector<8x32x8xf32>
    %49 = arith.mulf %1, %48 : vector<8x32x8xf32>
    %cst_13 = arith.constant dense<0.000000e+00> : vector<8x32xf32>
    %50 = vector.multi_reduction <add>, %49, %cst_13 [2] : vector<8x32x8xf32> to vector<8x32xf32>
    %51 = vector.extract_strided_slice %31 {offsets = [1, 0], sizes = [1, 32], strides = [1, 1]} : vector<4x32xf32> to vector<1x32xf32>
    %52 = vector.broadcast %51 : vector<1x32xf32> to vector<8x32xf32>
    %53 = arith.addf %50, %52 : vector<8x32xf32>
    %54 = math.tanh %53 : vector<8x32xf32>
    %55 = vector.extract_strided_slice %5 {offsets = [0, 1], sizes = [1, 1], strides = [1, 1]} : vector<1x4xf32> to vector<1x1xf32>
    %56 = vector.broadcast %55 : vector<1x1xf32> to vector<8x32xf32>
    %57 = arith.mulf %56, %54 : vector<8x32xf32>
    %58 = arith.addf %45, %57 : vector<8x32xf32>
    %59 = vector.extract_strided_slice %3 {offsets = [2, 0], sizes = [1, 8], strides = [1, 1]} : vector<4x8xf32> to vector<1x8xf32>
    %60 = vector.shape_cast %59 : vector<1x8xf32> to vector<1x1x8xf32>
    %61 = vector.broadcast %60 : vector<1x1x8xf32> to vector<8x32x8xf32>
    %62 = arith.mulf %1, %61 : vector<8x32x8xf32>
    %cst_14 = arith.constant dense<0.000000e+00> : vector<8x32xf32>
    %63 = vector.multi_reduction <add>, %62, %cst_14 [2] : vector<8x32x8xf32> to vector<8x32xf32>
    %64 = vector.extract_strided_slice %31 {offsets = [2, 0], sizes = [1, 32], strides = [1, 1]} : vector<4x32xf32> to vector<1x32xf32>
    %65 = vector.broadcast %64 : vector<1x32xf32> to vector<8x32xf32>
    %66 = arith.addf %63, %65 : vector<8x32xf32>
    %67 = math.tanh %66 : vector<8x32xf32>
    %68 = vector.extract_strided_slice %5 {offsets = [0, 2], sizes = [1, 1], strides = [1, 1]} : vector<1x4xf32> to vector<1x1xf32>
    %69 = vector.broadcast %68 : vector<1x1xf32> to vector<8x32xf32>
    %70 = arith.mulf %69, %67 : vector<8x32xf32>
    %71 = arith.addf %58, %70 : vector<8x32xf32>
    %72 = vector.extract_strided_slice %3 {offsets = [3, 0], sizes = [1, 8], strides = [1, 1]} : vector<4x8xf32> to vector<1x8xf32>
    %73 = vector.shape_cast %72 : vector<1x8xf32> to vector<1x1x8xf32>
    %74 = vector.broadcast %73 : vector<1x1x8xf32> to vector<8x32x8xf32>
    %75 = arith.mulf %1, %74 : vector<8x32x8xf32>
    %cst_15 = arith.constant dense<0.000000e+00> : vector<8x32xf32>
    %76 = vector.multi_reduction <add>, %75, %cst_15 [2] : vector<8x32x8xf32> to vector<8x32xf32>
    %77 = vector.extract_strided_slice %31 {offsets = [3, 0], sizes = [1, 32], strides = [1, 1]} : vector<4x32xf32> to vector<1x32xf32>
    %78 = vector.broadcast %77 : vector<1x32xf32> to vector<8x32xf32>
    %79 = arith.addf %76, %78 : vector<8x32xf32>
    %80 = math.tanh %79 : vector<8x32xf32>
    %81 = vector.extract_strided_slice %5 {offsets = [0, 3], sizes = [1, 1], strides = [1, 1]} : vector<1x4xf32> to vector<1x1xf32>
    %82 = vector.broadcast %81 : vector<1x1xf32> to vector<8x32xf32>
    %83 = arith.mulf %82, %80 : vector<8x32xf32>
    %84 = arith.addf %71, %83 : vector<8x32xf32>
    %85 = tpu.transpose %84, [1, 0] : vector<8x32xf32> -> vector<32x8xf32>
    %cst_16 = arith.constant dense<0xFF800000> : vector<32xf32>
    %86 = vector.multi_reduction <maximumf>, %85, %cst_16 [1] : vector<32x8xf32> to vector<32xf32>
    %87 = vector.shape_cast %86 : vector<32xf32> to vector<32x1xf32>
    %88 = vector.broadcast %87 : vector<32x1xf32> to vector<32x8xf32>
    %89 = arith.subf %85, %88 : vector<32x8xf32>
    %90 = math.exp %89 : vector<32x8xf32>
    %cst_17 = arith.constant dense<0.000000e+00> : vector<32xf32>
    %91 = vector.multi_reduction <add>, %90, %cst_17 [1] : vector<32x8xf32> to vector<32xf32>
    %92 = vector.shape_cast %91 : vector<32xf32> to vector<32x1xf32>
    %93 = tpu.reciprocal %92 {approx = true} : vector<32x1xf32> -> vector<32x1xf32>
    %94 = arith.mulf %92, %93 : vector<32x1xf32>
    %cst_18 = arith.constant 2.000000e+00 : f32
    %95 = vector.broadcast %cst_18 : f32 to vector<32x1xf32>
    %96 = arith.subf %95, %94 : vector<32x1xf32>
    %97 = arith.mulf %93, %96 : vector<32x1xf32>
    %98 = vector.broadcast %97 : vector<32x1xf32> to vector<32x8xf32>
    %99 = arith.mulf %90, %98 : vector<32x8xf32>
    %c0_19 = arith.constant 0 : index
    %c0_20 = arith.constant 0 : index
    %100 = vector.load %arg7[%c0_19, %c0_20] : memref<32x8xf32, #tpu.memory_space<vmem>>, vector<32x8xf32>
    tpu.vector_store %arg7[%c0_19, %c0_20], %99 {strides = array<i32>} : memref<32x8xf32, #tpu.memory_space<vmem>>, vector<32x8xf32>,
    return
  }
  func.func @transform_0(%arg0: i32) -> (i32, i32) {
    %c0_i32 = arith.constant 0 : i32
    %c0_i32_0 = arith.constant 0 : i32
    %c0_i32_1 = arith.constant 0 : i32
    return %c0_i32, %c0_i32_0 : i32, i32
  }
  func.func @transform_1(%arg0: i32) -> (i32, i32, i32) {
    %c0_i32 = arith.constant 0 : i32
    %c0_i32_0 = arith.constant 0 : i32
    %c0_i32_1 = arith.constant 0 : i32
    %c0_i32_2 = arith.constant 0 : i32
    return %c0_i32, %c0_i32_0, %c0_i32_1 : i32, i32, i32
  }
  func.func @transform_2(%arg0: i32) -> (i32, i32) {
    %c0_i32 = arith.constant 0 : i32
    %c0_i32_0 = arith.constant 0 : i32
    %c0_i32_1 = arith.constant 0 : i32
    return %c0_i32, %c0_i32_0 : i32, i32
  }
  func.func @transform_3(%arg0: i32) -> (i32, i32) {
    %c0_i32 = arith.constant 0 : i32
    %c0_i32_0 = arith.constant 0 : i32
    %c0_i32_1 = arith.constant 0 : i32
    return %c0_i32, %c0_i32_0 : i32, i32
  }
  func.func @transform_4(%arg0: i32) -> (i32, i32) {
    %c0_i32 = arith.constant 0 : i32
    %c0_i32_0 = arith.constant 0 : i32
    %c0_i32_1 = arith.constant 0 : i32
    return %c0_i32, %c0_i32_0 : i32, i32
  }
  func.func @transform_5(%arg0: i32) -> (i32, i32) {
    %c0_i32 = arith.constant 0 : i32
    %c0_i32_0 = arith.constant 0 : i32
    %c0_i32_1 = arith.constant 0 : i32
    return %c0_i32, %c0_i32_0 : i32, i32
  }
  func.func @transform_6(%arg0: i32) -> (i32, i32) {
    %c0_i32 = arith.constant 0 : i32
    %c0_i32_0 = arith.constant 0 : i32
    %c0_i32_1 = arith.constant 0 : i32
    return %c0_i32, %c0_i32_0 : i32, i32
  }
}

</mosaic_0001>

<bundles_post_ra>
// kernel: tpu_custom_call.1
= control target key start
LH: loop header
LB: loop body
LE: loop exit
PB: predicated region body
PF: predicated region fallthrough
CT: control target
= control target key end

     0   :  { %v1921_v0 = vmov 1   ;;  %v3660_v1 = vmov 0   ;;  %v3662_v6 = vmov 2   ;;  %v3659_v8 = vmov 3   ;;  %s3651_s2 = inlined_call_operand.vmem [shape: f32[4,4], index: 2, kind: input, shape index: {}]   ;;  %s3652_s0 = inlined_call_operand.vmem [shape: f32[32,4], index: 0, kind: input, shape index: {}]   ;;  %s3653_s4 = inlined_call_operand.vmem [shape: f32[4,1], index: 4, kind: input, shape index: {}]   ;;  %s3654_s3 = inlined_call_operand.vmem [shape: f32[4,8], index: 3, kind: input, shape index: {}]   ;;  %s3655_s1 = inlined_call_operand.vmem [shape: f32[8,32,8], index: 1, kind: input, shape index: {}]   ;;  %s3656_s5 = inlined_call_operand.vmem [shape: f32[1,4], index: 5, kind: input, shape index: {}]   ;;  %s3657_s6 = inlined_call_operand.vmem [shape: f32[32,8], index: 6, kind: output, shape index: {}]  }
   0x1   :  { %1605 = vset.pattern.permute.xlu2 %v1921_v0  ;;  %1604 = vset.pattern.permute.xlu1 %v3660_v1  ;;  %v59_v2 = vld [vmem:[%s3651_s2] sm:$0xf]  ;;  %v24_v5 = vld [vmem:[%s3652_s0 + $0x8] sm:$0xff]  ;;  %v25_v7 = vld [vmem:[%s3652_s0 + $0x10] sm:$0xff]  ;;  %vm162_vm0 = vcmask 64512   ;;  %vm1429_vm1 = vcmask 130112  }
   0x2   :  { %v23_v3 = vld [vmem:[%s3652_s0] sm:$0xff]  ;;  %109 = vperm.xlu2 %1605, %v59_v2   ;;  %97 = vperm.xlu1 %1604, %v59_v2   ;;  %v26_v9 = vld [vmem:[%s3652_s0 + $0x18] sm:$0xff]  ;;  %v2006_v16 = vld [vmem:[%s3655_s1 + $0x8] sm:$0xff]  ;;  %vm1433_vm2 = vcmask 195712   ;;  %vm1437_vm3 = vcmask 261312   ;;  %vm1488_vm4 = vcmask 1041409  }
   0x3   :  { %63 = vxpose.xlu0.b32.start [1/4] (short) (narrow) %v23_v3, 8  ;;  %v61_v4 = vld [vmem:[%s3653_s4] sm:$0xf]  ;;  %v2001_v15 = vld [vmem:[%s3655_s1 + $0x18] sm:$0xff]  ;;  %v2022_v22 = vld [vmem:[%s3655_s1 + $0x28] sm:$0xff]  ;;  %vm1490_vm5 = vcmask 1042434  }
   0x4   :  { %v1985_v10 = vld [vmem:[%s3654_s3] sm:$0xf]  ;;  %v2033_v27 = vld [vmem:[%s3655_s1 + $0x30] sm:$0xff]  ;;  %v2038_v28 = vld [vmem:[%s3655_s1 + $0x38] sm:$0xff]  ;;  %vm1492_vm6 = vcmask 1043459   ;;  %vm1494_vm7 = vcmask 1044484  }
   0x5   :  { %v1988_v11 = vperm.slane %v1985_v10, 0  ;;  %v1993_v12 = vld [vmem:[%s3655_s1] sm:$0xff]  ;;  %v2054_v34 = vld [vmem:[%s3655_s1 + $0x48] sm:$0xff]  ;;  %v2065_v39 = vld [vmem:[%s3655_s1 + $0x50] sm:$0xff]  ;;  %vm1496_vm8 = vcmask 1045509   ;;  %vm1498_vm9 = vcmask 1046534  }
   0x6   :  { %v2017_v21 = vld [vmem:[%s3655_s1 + $0x20] sm:$0xff]  ;;  %v2070_v40 = vld [vmem:[%s3655_s1 + $0x58] sm:$0xff]  ;;  %v2086_v46 = vld [vmem:[%s3655_s1 + $0x68] sm:$0xff]  ;;  %vm1500_vm10 = vcmask 1047559  }
   0x7   :  { %v130_v13 = vmul.f32 %v1988_v11, %v1993_v12  ;;  %v133_v17 = vmul.f32 %v1988_v11, %v2001_v15  ;;  %v131_v18 = vmul.f32 %v1988_v11, %v2006_v16  ;;  %v134_v23 = vmul.f32 %v1988_v11, %v2017_v21  ;;  %v2049_v33 = vld [vmem:[%s3655_s1 + $0x40] sm:$0xff]  ;;  %v2097_v51 = vld [vmem:[%s3655_s1 + $0x70] sm:$0xff]  ;;  %v2102_v52 = vld [vmem:[%s3655_s1 + $0x78] sm:$0xff] }
   0x8   :  { %v135_v24 = vmul.f32 %v1988_v11, %v2022_v22  ;;  %v136_v29 = vmul.f32 %v1988_v11, %v2033_v27  ;;  %v137_v30 = vmul.f32 %v1988_v11, %v2038_v28  ;;  %v138_v35 = vmul.f32 %v1988_v11, %v2049_v33  ;;  %v2081_v45 = vld [vmem:[%s3655_s1 + $0x60] sm:$0xff]  ;;  %v2118_v58 = vld [vmem:[%s3655_s1 + $0x88] sm:$0xff]  ;;  %v2129_v63 = vld [vmem:[%s3655_s1 + $0x90] sm:$0xff] }
   0x9   :  { %v163_v14 = vsel %vm162_vm0, %v130_v13, 0.0  ;;  %v172_v19 = vsel %vm162_vm0, %v133_v17, 0.0  ;;  %v166_v20 = vsel %vm162_vm0, %v131_v18, 0.0  ;;  %v175_v25 = vsel %vm162_vm0, %v134_v23, 0.0  ;;  %v2113_v57 = vld [vmem:[%s3655_s1 + $0x80] sm:$0xff]  ;;  %v2150_v13 = vld [vmem:[%s3655_s1 + $0xa8] sm:$0xff] }
   0xa   :  { %1606 = vset.pattern.permute.xlu2 %v3662_v6  ;;  %104 = vperm.xlu1 %1604, %v61_v4   ;;  %v178_v26 = vsel %vm162_vm0, %v135_v24, 0.0  ;;  %v181_v31 = vsel %vm162_vm0, %v136_v29, 0.0  ;;  %v184_v32 = vsel %vm162_vm0, %v137_v30, 0.0  ;;  %v139_v36 = vmul.f32 %v1988_v11, %v2054_v34  ;;  %v2166_v23 = vld [vmem:[%s3655_s1 + $0xb0] sm:$0xff]  ;;  %v2171_v24 = vld [vmem:[%s3655_s1 + $0xb8] sm:$0xff] }
   0xb   :  { %64 = vxpose.xlu0.b32.cont [2/4] (short) (narrow) %v24_v5, 8  ;;  %116 = vperm.xlu2 %1606, %v59_v2   ;;  %v187_v37 = vsel %vm162_vm0, %v138_v35, 0.0  ;;  %v140_v41 = vmul.f32 %v1988_v11, %v2065_v39  ;;  %v141_v42 = vmul.f32 %v1988_v11, %v2070_v40  ;;  %v142_v47 = vmul.f32 %v1988_v11, %v2081_v45  ;;  %v2185_v35 = vld [vmem:[%s3655_s1 + $0xc0] sm:$0xff] }
   0xc   :  { %v190_v38 = vsel %vm162_vm0, %v139_v36, 0.0  ;;  %v143_v48 = vmul.f32 %v1988_v11, %v2086_v46  ;;  %v144_v53 = vmul.f32 %v1988_v11, %v2097_v51  ;;  %v145_v54 = vmul.f32 %v1988_v11, %v2102_v52  ;;  %v2190_v36 = vld [vmem:[%s3655_s1 + $0xc8] sm:$0xff] }
   0xd   :  { %v193_v43 = vsel %vm162_vm0, %v140_v41, 0.0  ;;  %v196_v44 = vsel %vm162_vm0, %v141_v42, 0.0  ;;  %v199_v49 = vsel %vm162_vm0, %v142_v47, 0.0  ;;  %v146_v59 = vmul.f32 %v1988_v11, %v2113_v57 }
   0xe   :  { %v202_v50 = vsel %vm162_vm0, %v143_v48, 0.0  ;;  %v205_v55 = vsel %vm162_vm0, %v144_v53, 0.0  ;;  %v208_v56 = vsel %vm162_vm0, %v145_v54, 0.0  ;;  %v147_v60 = vmul.f32 %v1988_v11, %v2118_v58  ;;  %v2217_v53 = vld [vmem:[%s3655_s1 + $0xe0] sm:$0xff]  ;;  %v2222_v54 = vld [vmem:[%s3655_s1 + $0xe8] sm:$0xff] }
   0xf   :  { %v211_v61 = vsel %vm162_vm0, %v146_v59, 0.0  ;;  %v148_v3 = vmul.f32 %v1988_v11, %v2129_v63  ;;  %v151_v17 = vmul.f32 %v1988_v11, %v2150_v13  ;;  %v153_v29 = vmul.f32 %v1988_v11, %v2171_v24 }
  0x10   :  { %v214_v62 = vsel %vm162_vm0, %v147_v60, 0.0  ;;  %v155_v41 = vmul.f32 %v1988_v11, %v2190_v36  ;;  %v158_v59 = vmul.f32 %v1988_v11, %v2217_v53 }
  0x11   :  { %v217_v5 = vsel %vm162_vm0, %v148_v3, 0.0 }
  0x12   :  { %1607 = vset.pattern.permute.xlu1 %v3659_v8  ;;  %v238_v47 = vsel %vm162_vm0, %v155_v41, 0.0  ;;  %v247_v3 = vsel %vm162_vm0, %v158_v59, 0.0 }
  0x13   :  { %65 = vxpose.xlu0.b32.cont [3/4] (short) (narrow) %v25_v7, 8  ;;  %123 = vperm.xlu1 %1607, %v59_v2   ;;  %v2134_v2 = vld [vmem:[%s3655_s1 + $0x98] sm:$0xff] }
  0x14   :  { %v149_v4 = vmul.f32 %v1988_v11, %v2134_v2 }
  0x16   :  { %v220_v7 = vsel %vm162_vm0, %v149_v4, 0.0 }
  0x1b   :  { %66 = vxpose.xlu0.b32.end [4/4] (short) (narrow) %v26_v9, 8  ;;  %v2145_v9 = vld [vmem:[%s3655_s1 + $0xa0] sm:$0xff] }
  0x34   :  { %164 = vadd.xlane.f32.xlu2 %v163_v14  ;;  %v150_v14 = vmul.f32 %v1988_v11, %v2145_v9 }
  0x36   :  { %v223_v18 = vsel %vm162_vm0, %v150_v14, 0.0  ;;  %v2249_v14 = vperm.slane %v1985_v10, 1 }
  0x38   :  { %v453_v8 = vmul.f32 %v2249_v14, %v2222_v54 }
  0x3c   :  { %173 = vadd.xlane.f32.xlu2 %v172_v19  ;;  %v226_v19 = vsel %vm162_vm0, %v151_v17, 0.0 }
  0x3d   :  { %167 = vadd.xlane.f32.xlu1 %v166_v20  ;;  %v2161_v20 = vld [vmem:[%s3655_s1 + $0x10] sm:$0xff] }
  0x44   :  { %176 = vadd.xlane.f32.xlu2 %v175_v25  ;;  %v132_v25 = vmul.f32 %v1988_v11, %v2161_v20 }
  0x45   :  { %179 = vadd.xlane.f32.xlu1 %v178_v26  ;;  %v152_v26 = vmul.f32 %v1988_v11, %v2166_v23 }
  0x46   :  { %v169_v30 = vsel %vm162_vm0, %v132_v25, 0.0 }
  0x4c   :  { %182 = vadd.xlane.f32.xlu2 %v181_v31  ;;  %v229_v31 = vsel %vm162_vm0, %v152_v26, 0.0 }
  0x4d   :  { %185 = vadd.xlane.f32.xlu1 %v184_v32  ;;  %v232_v32 = vsel %vm162_vm0, %v153_v29, 0.0 }
  0x54   :  { %188 = vadd.xlane.f32.xlu2 %v187_v37  ;;  %v2195_v37 = vld [vmem:[%s3655_s1 + $0xd0] sm:$0xff] }
  0x55   :  { %191 = vadd.xlane.f32.xlu1 %v190_v38  ;;  %v154_v38 = vmul.f32 %v1988_v11, %v2185_v35  ;;  %v156_v42 = vmul.f32 %v1988_v11, %v2195_v37 }
  0x5c   :  { %194 = vadd.xlane.f32.xlu2 %v193_v43  ;;  %v3658_v43 = vlaneseq }
  0x5d   :  { %197 = vadd.xlane.f32.xlu1 %v196_v44  ;;  %v235_v44 = vsel %vm162_vm0, %v154_v38, 0.0 }
  0x5e   :  { %v2206_v48 = vshrl.u32 %v3658_v43, 7 }
  0x64   :  { %200 = vadd.xlane.f32.xlu2 %v199_v49  ;;  %v241_v49 = vsel %vm162_vm0, %v156_v42, 0.0 }
  0x65   :  { %203 = vadd.xlane.f32.xlu1 %v202_v50  ;;  %v2212_v50 = vld [vmem:[%s3655_s1 + $0xd8] sm:$0xff] }
  0x6c   :  { %206 = vadd.xlane.f32.xlu2 %v205_v55  ;;  %v2225_v55 = vadd.s32 16, %v2206_v48 }
  0x6d   :  { %209 = vadd.xlane.f32.xlu1 %v208_v56  ;;  %v157_v56 = vmul.f32 %v1988_v11, %v2212_v50 }
  0x6e   :  { %1608 = vset.pattern.permute.xlu2 %v2225_v55 }
  0x74   :  { %212 = vadd.xlane.f32.xlu2 %v211_v61  ;;  %v98_v60 = vpop.permute.xlu1 %97  ;;  %v159_v61 = vmul.f32 %v1988_v11, %v2222_v54 }
  0x75   :  { %215 = vadd.xlane.f32.xlu1 %v214_v62  ;;  %v244_v62 = vsel %vm162_vm0, %v157_v56, 0.0 }
  0x76   :  { %v250_v4 = vsel %vm162_vm0, %v159_v61, 0.0 }
  0x7c   :  { %218 = vadd.xlane.f32.xlu2 %v217_v5  ;;  %v2241_v5 = vld [vmem:[%s3655_s1 + $0xf0] sm:$0xff]  ;;  %v105_v25 = vpop.permute.xlu1 %104 }
  0x7d   :  { %221 = vadd.xlane.f32.xlu1 %v220_v7  ;;  %v2246_v7 = vld [vmem:[%s3655_s1 + $0xf8] sm:$0xff]  ;;  %v160_v17 = vmul.f32 %v1988_v11, %v2241_v5 }
  0x7e   :  { %v455_v43 = vmul.f32 %v2249_v14, %v2246_v7 }
  0x7f   :  { %v253_v26 = vsel %vm162_vm0, %v160_v17, 0.0  ;;  %v429_v17 = vmul.f32 %v2249_v14, %v2022_v22 }
  0x82   :  { %1614 = vset.pattern.permute.xlu0 %v2225_v55 }
  0x84   :  { %224 = vadd.xlane.f32.xlu2 %v223_v18  ;;  %v161_v18 = vmul.f32 %v1988_v11, %v2246_v7  ;;  %v427_v11 = vmul.f32 %v2249_v14, %v2001_v15 }
  0x85   :  { %227 = vadd.xlane.f32.xlu1 %v226_v19  ;;  %v424_v19 = vmul.f32 %v2249_v14, %v1993_v12  ;;  %v124_v41 = vpop.permute.xlu1 %123 }
  0x86   :  { %v256_v29 = vsel %vm162_vm0, %v161_v18, 0.0  ;;  %v465_v56 = vsel %vm162_vm0, %v427_v11, 0.0 }
  0x8c   :  { %170 = vadd.xlane.f32.xlu0 %v169_v30  ;;  %230 = vadd.xlane.f32.xlu2 %v229_v31  ;;  %v456_v30 = vsel %vm162_vm0, %v424_v19, 0.0  ;;  %v110_v31 = vpop.permute.xlu2 %109 }
  0x8d   :  { %233 = vadd.xlane.f32.xlu1 %v232_v32  ;;  %v426_v32 = vmul.f32 %v2249_v14, %v2161_v20 }
  0x94   :  { %236 = vadd.xlane.f32.xlu0 %v235_v44  ;;  %239 = vadd.xlane.f32.xlu2 %v238_v47  ;;  %v462_v47 = vsel %vm162_vm0, %v426_v32, 0.0  ;;  %v117_v18 = vpop.permute.xlu2 %116  ;;  %v434_v32 = vmul.f32 %v2249_v14, %v2065_v39 }
  0x95   :  { %242 = vadd.xlane.f32.xlu1 %v241_v49 }
  0x9c   :  { %245 = vadd.xlane.f32.xlu0 %v244_v62  ;;  %248 = vadd.xlane.f32.xlu2 %v247_v3  ;;  %v431_v3 = vmul.f32 %v2249_v14, %v2038_v28 }
  0x9d   :  { %251 = vadd.xlane.f32.xlu1 %v250_v4 }
  0xa4   :  { %254 = vadd.xlane.f32.xlu0 %v253_v26  ;;  %257 = vadd.xlane.f32.xlu2 %v256_v29 }
  0xa5   :  { %457 = vadd.xlane.f32.xlu1 %v456_v30 }
  0xa7   :  { %v79_v38 = vpop.trf.xlu0 }
  0xa8   :  { %v100_v42 = vperm.slane %v79_v38, 0  ;;  %v112_v44 = vperm.slane %v79_v38, 1  ;;  %v119_v62 = vperm.slane %v79_v38, 2  ;;  %v126_v26 = vperm.slane %v79_v38, 3  ;;  %v2282_v38 = vpop.xlane.xlu2 %164 }
  0xa9   :  { %3669 = vst [vmem:[#allocation4_spill] sm:$0xff] %v2282_v38 }
  0xaa   :  { %v101_v49 = vmul.f32 %v100_v42, %v98_v60  ;;  %v113_v61 = vmul.f32 %v112_v44, %v110_v31  ;;  %v120_v19 = vmul.f32 %v119_v62, %v117_v18  ;;  %v477_v60 = vsel %vm162_vm0, %v431_v3, 0.0  ;;  %v2300_v3 = vld [vmem:[%s3656_s5] ss:$0 sm:$0xff] }
  0xab   :  { %v127_v31 = vmul.f32 %v126_v26, %v124_v41  ;;  %v432_v42 = vmul.f32 %v2249_v14, %v2049_v33  ;;  %v440_v18 = vmul.f32 %v2249_v14, %v2113_v57 }
  0xac   :  { %v107_v59 = vadd.f32 %v105_v25, %v101_v49  ;;  %463 = vadd.xlane.f32.xlu0 %v462_v47  ;;  %v471_v25 = vsel %vm162_vm0, %v429_v17, 0.0  ;;  %v486_v47 = vsel %vm162_vm0, %v434_v32, 0.0  ;;  %v441_v32 = vmul.f32 %v2249_v14, %v2118_v58 }
  0xad   :  { %466 = vadd.xlane.f32.xlu1 %v465_v56  ;;  %v480_v41 = vsel %vm162_vm0, %v432_v42, 0.0  ;;  %v437_v56 = vmul.f32 %v2249_v14, %v2086_v46 }
  0xae   :  { %v114_v4 = vadd.f32 %v113_v61, %v107_v59  ;;  %v435_v59 = vmul.f32 %v2249_v14, %v2070_v40 }
  0xaf   :  { %v495_v62 = vsel %vm162_vm0, %v437_v56, 0.0  ;;  %v446_v56 = vmul.f32 %v2249_v14, %v2166_v23 }
  0xb0   :  { %v2270_v29 = vpop.xlane.xlu1 %167  ;;  %v121_v30 = vadd.f32 %v120_v19, %v114_v4  ;;  %v489_v4 = vsel %vm162_vm0, %v435_v59, 0.0  ;;  %v2303_v17 = vpop.xlane.xlu2 %173  ;;  %v438_v19 = vmul.f32 %v2249_v14, %v2097_v51  ;;  %v444_v59 = vmul.f32 %v2249_v14, %v2145_v9 }
  0xb1   :  { %3667 = vst [vmem:[#allocation2_spill] sm:$0xff] %v2270_v29 }
  0xb2   :  { %v2276_v11 = vadd.f32 %v127_v31, %v121_v30  ;;  %v498_v30 = vsel %vm162_vm0, %v438_v19, 0.0  ;;  %v443_v31 = vmul.f32 %v2249_v14, %v2134_v2  ;;  %v449_v19 = vmul.f32 %v2249_v14, %v2190_v36 }
  0xb4   :  { %478 = vadd.xlane.f32.xlu0 %v477_v60  ;;  %v2286_v49 = vperm.slane %v2276_v11, 0  ;;  %v504_v60 = vsel %vm162_vm0, %v440_v18, 0.0  ;;  %v516_v18 = vsel %vm162_vm0, %v444_v59, 0.0  ;;  %v450_v59 = vmul.f32 %v2249_v14, %v2195_v37 }
  0xb5   :  { %472 = vadd.xlane.f32.xlu1 %v471_v25 }
  0xb8   :  { %v2280_v44 = vpop.xlane.xlu1 %179  ;;  %v2315_v25 = vpop.xlane.xlu2 %176 }
  0xb9   :  { %3668 = vst [vmem:[#allocation3_spill] sm:$0xff] %v2280_v44 }
  0xba   :  { %3671 = vst [vmem:[#allocation6_spill] sm:$0xff] %v2315_v25 }
  0xbc   :  { %487 = vadd.xlane.f32.xlu0 %v486_v47  ;;  %277 = vperm.xlu2 %1608, %v2286_v49   ;;  %v513_v47 = vsel %vm162_vm0, %v443_v31, 0.0 }
  0xbd   :  { %481 = vadd.xlane.f32.xlu1 %v480_v41  ;;  %v507_v41 = vsel %vm162_vm0, %v441_v32, 0.0  ;;  %v531_v32 = vsel %vm162_vm0, %v449_v19, 0.0 }
  0xc0   :  { %v2294_v61 = vpop.xlane.xlu1 %185 }
  0xc4   :  { %496 = vadd.xlane.f32.xlu0 %v495_v62  ;;  %1609 = vset.pattern.permute.xlu2 %v3660_v1  ;;  %v2330_v62 = vpop.xlane.xlu2 %182  ;;  %v428_v1 = vmul.f32 %v2249_v14, %v2017_v21 }
  0xc5   :  { %490 = vadd.xlane.f32.xlu1 %v489_v4  ;;  %356 = vperm.xlu2 %1609, %v2300_v3   ;;  %v522_v4 = vsel %vm162_vm0, %v446_v56, 0.0  ;;  %v452_v56 = vmul.f32 %v2249_v14, %v2217_v53 }
  0xc7   :  { %v540_v19 = vsel %vm162_vm0, %v452_v56, 0.0  ;;  %v549_v56 = vsel %vm162_vm0, %v455_v43, 0.0 }
  0xc8   :  { %v2311_v26 = vpop.xlane.xlu1 %191 }
  0xc9   :  { %3670 = vst [vmem:[#allocation5_spill] sm:$0xff] %v2311_v26 }
  0xcc   :  { %505 = vadd.xlane.f32.xlu0 %v504_v60  ;;  %v447_v60 = vmul.f32 %v2249_v14, %v2171_v24  ;;  %v2342_v31 = vpop.xlane.xlu2 %188 }
  0xcd   :  { %499 = vadd.xlane.f32.xlu1 %v498_v30  ;;  %1611 = vset.pattern.permute.xlu2 %v1921_v0  ;;  %3673 = vst [vmem:[#allocation8_spill] sm:$0xff] %v2342_v31 }
  0xd0   :  { %v2322_v42 = vpop.xlane.xlu1 %197 }
  0xd4   :  { %514 = vadd.xlane.f32.xlu0 %v513_v47  ;;  %v525_v47 = vsel %vm162_vm0, %v447_v60, 0.0  ;;  %v534_v60 = vsel %vm162_vm0, %v450_v59, 0.0  ;;  %v2373_v59 = vperm.slane %v1985_v10, 2 }
  0xd5   :  { %508 = vadd.xlane.f32.xlu1 %v507_v41  ;;  %v2347_v41 = vadd.s32 24, %v2206_v48 }
  0xd7   :  { %3674 = vst [vmem:[#allocation9_spill] sm:$0xff] %v2347_v41  ;;  %1610 = vset.pattern.permute.xlu1 %v2347_v41 }
  0xd8   :  { %v2332_v0 = vpop.xlane.xlu1 %203 }
  0xd9   :  { %3672 = vst [vmem:[#allocation7_spill] sm:$0xff] %v2332_v0 }
  0xdc   :  { %523 = vadd.xlane.f32.xlu0 %v522_v4  ;;  %v425_v4 = vmul.f32 %v2249_v14, %v2006_v16 }
  0xdd   :  { %517 = vadd.xlane.f32.xlu1 %v516_v18 }
  0xe0   :  { %v2340_v30 = vpop.xlane.xlu1 %209 }
  0xe4   :  { %532 = vadd.xlane.f32.xlu0 %v531_v32  ;;  %v2360_v32 = vpop.xlane.xlu2 %194 }
  0xe5   :  { %526 = vadd.xlane.f32.xlu1 %v525_v47  ;;  %v459_v47 = vsel %vm162_vm0, %v425_v4, 0.0  ;;  %v543_v4 = vsel %vm162_vm0, %v453_v8, 0.0 }
  0xe8   :  { %v2356_v18 = vpop.xlane.xlu1 %215 }
  0xe9   :  { %3675 = vst [vmem:[#allocation10_spill] sm:$0xff] %v2356_v18  ;;  %v430_v18 = vmul.f32 %v2249_v14, %v2033_v27 }
  0xeb   :  { %v474_v26 = vsel %vm162_vm0, %v430_v18, 0.0  ;;  %v725_v18 = vmul.f32 %v2373_v59, %v2065_v39  ;;  %v439_v39 = vmul.f32 %v2249_v14, %v2102_v52 }
  0xec   :  { %541 = vadd.xlane.f32.xlu0 %v540_v19  ;;  %v468_v19 = vsel %vm162_vm0, %v428_v1, 0.0  ;;  %v722_v1 = vmul.f32 %v2373_v59, %v2038_v28  ;;  %v436_v28 = vmul.f32 %v2249_v14, %v2081_v45 }
  0xed   :  { %535 = vadd.xlane.f32.xlu1 %v534_v60  ;;  %v2377_v60 = vpop.xlane.xlu2 %200  ;;  %v777_v29 = vsel %vm162_vm0, %v725_v18, 0.0  ;;  %v501_v18 = vsel %vm162_vm0, %v439_v39, 0.0 }
  0xee   :  { %460 = vadd.xlane.f32.xlu2 %v459_v47  ;;  %3676 = vst [vmem:[#allocation11_spill] sm:$0xff] %v2377_v60  ;;  %v717_v47 = vmul.f32 %v2373_v59, %v2161_v20 }
  0xf0   :  { %v2369_v6 = vpop.xlane.xlu1 %221  ;;  %v753_v43 = vsel %vm162_vm0, %v717_v47, 0.0 }
  0xf4   :  { %550 = vadd.xlane.f32.xlu0 %v549_v56  ;;  %v433_v56 = vmul.f32 %v2249_v14, %v2054_v34 }
  0xf5   :  { %544 = vadd.xlane.f32.xlu1 %v543_v4  ;;  %v2389_v8 = vpop.xlane.xlu2 %206 }
  0xf6   :  { %469 = vadd.xlane.f32.xlu2 %v468_v19  ;;  %v483_v47 = vsel %vm162_vm0, %v433_v56, 0.0 }
  0xf8   :  { %v2383_v0 = vpop.xlane.xlu1 %227 }
  0xf9   :  { %3677 = vst [vmem:[#allocation12_spill] sm:$0xff] %v2383_v0  ;;  %v768_v0 = vsel %vm162_vm0, %v722_v1, 0.0  ;;  %v492_v1 = vsel %vm162_vm0, %v436_v28, 0.0  ;;  %v442_v28 = vmul.f32 %v2249_v14, %v2129_v63 }
  0xfc   :  { %754 = vadd.xlane.f32.xlu0 %v753_v43 }
  0xfd   :  { %v2407_v44 = vpop.xlane.xlu2 %212 }
  0xfe   :  { %475 = vadd.xlane.f32.xlu2 %v474_v26  ;;  %3679 = vst [vmem:[#allocation14_spill] sm:$0xff] %v2407_v44 }
  0xff   :  { %v2393_v4 = vpop.xlane.xlu0 %170 }
 0x100   :  { %v2395_v19 = vpop.xlane.xlu1 %233 }
 0x104   :  { %769 = vadd.xlane.f32.xlu0 %v768_v0  ;;  %v728_v0 = vmul.f32 %v2373_v59, %v2086_v46  ;;  %v731_v46 = vmul.f32 %v2373_v59, %v2113_v57  ;;  %v734_v57 = vmul.f32 %v2373_v59, %v2134_v2 }
 0x105   :  { %v2421_v31 = vpop.xlane.xlu2 %218 }
 0x106   :  { %484 = vadd.xlane.f32.xlu2 %v483_v47 }
 0x107   :  { %v2403_v26 = vpop.xlane.xlu0 %236 }
 0x108   :  { %3678 = vst [vmem:[#allocation13_spill] sm:$0xff] %v2403_v26  ;;  %v2405_v43 = vpop.xlane.xlu1 %242  ;;  %v786_v26 = vsel %vm162_vm0, %v728_v0, 0.0 }
 0x10c   :  { %778 = vadd.xlane.f32.xlu0 %v777_v29  ;;  %v2425_v29 = vperm.slane %v2276_v11, 1 }
 0x10d   :  { %v2438_v39 = vpop.xlane.xlu2 %224 }
 0x10e   :  { %283 = vperm.xlu1 %1610, %v2286_v49   ;;  %493 = vadd.xlane.f32.xlu2 %v492_v1  ;;  %3683 = vst [vmem:[#allocation18_spill] sm:$0xff] %v2438_v39 }
 0x10f   :  { %v2416_v56 = vpop.xlane.xlu0 %245 }
 0x110   :  { %v2418_v47 = vpop.xlane.xlu1 %251 }
 0x111   :  { %3680 = vst [vmem:[#allocation15_spill] sm:$0xff] %v2418_v47  ;;  %v795_v47 = vsel %vm162_vm0, %v731_v46, 0.0  ;;  %v804_v46 = vsel %vm162_vm0, %v734_v57, 0.0 }
 0x114   :  { %787 = vadd.xlane.f32.xlu0 %v786_v26  ;;  %v510_v26 = vsel %vm162_vm0, %v442_v28, 0.0 }
 0x115   :  { %v2453_v2 = vpop.xlane.xlu2 %230 }
 0x116   :  { %576 = vperm.xlu1 %1610, %v2425_v29   ;;  %502 = vadd.xlane.f32.xlu2 %v501_v18  ;;  %v445_v18 = vmul.f32 %v2249_v14, %v2150_v13 }
 0x117   :  { %v2432_v1 = vpop.xlane.xlu0 %254 }
 0x118   :  { %3681 = vst [vmem:[#allocation16_spill] sm:$0xff] %v2432_v1  ;;  %v2434_v0 = vpop.xlane.xlu1 %457  ;;  %v519_v28 = vsel %vm162_vm0, %v445_v18, 0.0  ;;  %v740_v18 = vmul.f32 %v2373_v59, %v2190_v36  ;;  %v454_v36 = vmul.f32 %v2249_v14, %v2241_v5 }
 0x119   :  { %3682 = vst [vmem:[#allocation17_spill] sm:$0xff] %v2434_v0 }
 0x11c   :  { %796 = vadd.xlane.f32.xlu0 %v795_v47  ;;  %v737_v47 = vmul.f32 %v2373_v59, %v2166_v23  ;;  %v451_v23 = vmul.f32 %v2249_v14, %v2212_v50 }
 0x11d   :  { %v2471_v38 = vpop.xlane.xlu2 %239 }
 0x11e   :  { %511 = vadd.xlane.f32.xlu2 %v510_v26  ;;  %1612 = vset.pattern.permute.xlu1 %v2206_v48  ;;  %v448_v26 = vmul.f32 %v2249_v14, %v2185_v35  ;;  %v813_v25 = vsel %vm162_vm0, %v737_v47, 0.0  ;;  %3686 = vst [vmem:[#allocation21_spill] sm:$0xff] %v2471_v38  ;;  %v537_v47 = vsel %vm162_vm0, %v451_v23, 0.0  ;;  %v746_v23 = vmul.f32 %v2373_v59, %v2246_v7 }
 0x11f   :  { %v2445_v44 = vpop.xlane.xlu0 %463  ;;  %v720_v7 = vmul.f32 %v2373_v59, %v2022_v22 }
 0x120   :  { %v2447_v60 = vpop.xlane.xlu1 %466  ;;  %v528_v57 = vsel %vm162_vm0, %v448_v26, 0.0 }
 0x124   :  { %805 = vadd.xlane.f32.xlu0 %v804_v46 }
 0x126   :  { %520 = vadd.xlane.f32.xlu2 %v519_v28 }
 0x127   :  { %v2457_v0 = vpop.xlane.xlu0 %478 }
 0x128   :  { %v2459_v39 = vpop.xlane.xlu1 %472 }
 0x129   :  { %3684 = vst [vmem:[#allocation19_spill] sm:$0xff] %v2459_v39  ;;  %v822_v39 = vsel %vm162_vm0, %v740_v18, 0.0  ;;  %v2486_v18 = vpop.xlane.xlu2 %248 }
 0x12a   :  { %3688 = vst [vmem:[#allocation23_spill] sm:$0xff] %v2486_v18 }
 0x12c   :  { %814 = vadd.xlane.f32.xlu0 %v813_v25  ;;  %v743_v25 = vmul.f32 %v2373_v59, %v2217_v53 }
 0x12e   :  { %529 = vadd.xlane.f32.xlu2 %v528_v57  ;;  %v831_v57 = vsel %vm162_vm0, %v743_v25, 0.0 }
 0x12f   :  { %v2467_v46 = vpop.xlane.xlu0 %487 }
 0x130   :  { %v2469_v28 = vpop.xlane.xlu1 %481 }
 0x131   :  { %3685 = vst [vmem:[#allocation20_spill] sm:$0xff] %v2469_v28  ;;  %v715_v28 = vmul.f32 %v2373_v59, %v1993_v12  ;;  %v718_v12 = vmul.f32 %v2373_v59, %v2001_v15  ;;  %v723_v15 = vmul.f32 %v2373_v59, %v2049_v33  ;;  %v2526_v33 = vperm.slane %v2276_v11, 2 }
 0x133   :  { %v747_v53 = vsel %vm162_vm0, %v715_v28, 0.0 }
 0x134   :  { %823 = vadd.xlane.f32.xlu0 %v822_v39  ;;  %v546_v39 = vsel %vm162_vm0, %v454_v36, 0.0  ;;  %v756_v36 = vsel %vm162_vm0, %v718_v12, 0.0 }
 0x136   :  { %538 = vadd.xlane.f32.xlu2 %v537_v47  ;;  %v840_v47 = vsel %vm162_vm0, %v746_v23, 0.0 }
 0x137   :  { %v2479_v26 = vpop.xlane.xlu0 %496 }
 0x138   :  { %3687 = vst [vmem:[#allocation22_spill] sm:$0xff] %v2479_v26  ;;  %v2484_v38 = vpop.xlane.xlu1 %490  ;;  %v2499_v26 = vpop.xlane.xlu2 %257 }
 0x13c   :  { %832 = vadd.xlane.f32.xlu0 %v831_v57  ;;  %v762_v57 = vsel %vm162_vm0, %v720_v7, 0.0  ;;  %v726_v7 = vmul.f32 %v2373_v59, %v2070_v40 }
 0x13e   :  { %547 = vadd.xlane.f32.xlu2 %v546_v39 }
 0x13f   :  { %v2492_v14 = vpop.xlane.xlu0 %505 }
 0x140   :  { %3689 = vst [vmem:[#allocation24_spill] sm:$0xff] %v2492_v14  ;;  %748 = vadd.xlane.f32.xlu1 %v747_v53  ;;  %v2497_v25 = vpop.xlane.xlu1 %499  ;;  %v2507_v53 = vpop.permute.xlu2 %277 }
 0x144   :  { %841 = vadd.xlane.f32.xlu0 %v840_v47  ;;  %v771_v47 = vsel %vm162_vm0, %v723_v15, 0.0 }
 0x147   :  { %v515_v28 = vpop.xlane.xlu0 %514 }
 0x148   :  { %757 = vadd.xlane.f32.xlu1 %v756_v36  ;;  %v2505_v39 = vpop.xlane.xlu1 %508  ;;  %v2520_v36 = vpop.permute.xlu2 %356 }
 0x149   :  { %3690 = vst [vmem:[#allocation25_spill] sm:$0xff] %v2505_v39 }
 0x14f   :  { %v2509_v23 = vpop.xlane.xlu0 %523 }
 0x150   :  { %763 = vadd.xlane.f32.xlu1 %v762_v57  ;;  %v2518_v22 = vpop.xlane.xlu1 %517  ;;  %v780_v57 = vsel %vm162_vm0, %v726_v7, 0.0  ;;  %v732_v7 = vmul.f32 %v2373_v59, %v2118_v58  ;;  %v716_v58 = vmul.f32 %v2373_v59, %v2006_v16  ;;  %v741_v16 = vmul.f32 %v2373_v59, %v2195_v37 }
 0x151   :  { %3692 = vst [vmem:[#allocation27_spill] sm:$0xff] %v2518_v22 }
 0x152   :  { %v750_v18 = vsel %vm162_vm0, %v716_v58, 0.0  ;;  %v825_v58 = vsel %vm162_vm0, %v741_v16, 0.0 }
 0x156   :  { %647 = vperm.xlu2 %1611, %v2300_v3  }
 0x157   :  { %v2515_v12 = vpop.xlane.xlu0 %532 }
 0x158   :  { %3691 = vst [vmem:[#allocation26_spill] sm:$0xff] %v2515_v12  ;;  %570 = vperm.xlu0 %1614, %v2425_v29   ;;  %772 = vadd.xlane.f32.xlu1 %v771_v47  ;;  %v729_v47 = vmul.f32 %v2373_v59, %v2097_v51  ;;  %v527_v39 = vpop.xlane.xlu1 %526 }
 0x15a   :  { %v789_v22 = vsel %vm162_vm0, %v729_v47, 0.0  ;;  %v735_v47 = vmul.f32 %v2373_v59, %v2145_v9 }
 0x15f   :  { %v2528_v15 = vpop.xlane.xlu0 %541 }
 0x160   :  { %3693 = vst [vmem:[#allocation28_spill] sm:$0xff] %v2528_v15  ;;  %861 = vperm.xlu0 %1614, %v2526_v33   ;;  %781 = vadd.xlane.f32.xlu1 %v780_v57  ;;  %v2541_v15 = vpop.xlane.xlu1 %535  ;;  %v798_v57 = vsel %vm162_vm0, %v732_v7, 0.0 }
 0x161   :  { %v2531_v12 = vpop.xlane.xlu2 %460 }
 0x162   :  { %3694 = vst [vmem:[#allocation29_spill] sm:$0xff] %v2531_v12 }
 0x167   :  { %v551_v14 = vpop.xlane.xlu0 %550 }
 0x168   :  { %1615 = vset.pattern.permute.xlu0 %v2347_v41  ;;  %790 = vadd.xlane.f32.xlu1 %v789_v22  ;;  %v807_v22 = vsel %vm162_vm0, %v735_v47, 0.0  ;;  %v2552_v41 = vpop.xlane.xlu1 %544 }
 0x169   :  { %v2537_v40 = vpop.xlane.xlu2 %469  ;;  %3696 = vst [vmem:[#allocation31_spill] sm:$0xff] %v2552_v41 }
 0x16a   :  { %3695 = vst [vmem:[#allocation30_spill] sm:$0xff] %v2537_v40 }
 0x16f   :  { %v2544_v12 = vpop.xlane.xlu0 %754 }
 0x170   :  { %867 = vperm.xlu0 %1615, %v2526_v33   ;;  %799 = vadd.xlane.f32.xlu1 %v798_v57  ;;  %v738_v57 = vmul.f32 %v2373_v59, %v2171_v24 }
 0x171   :  { %v2547_v51 = vpop.xlane.xlu2 %475 }
 0x172   :  { %v816_v1 = vsel %vm162_vm0, %v738_v57, 0.0 }
 0x177   :  { %v2554_v40 = vpop.xlane.xlu0 %769 }
 0x178   :  { %3697 = vst [vmem:[#allocation32_spill] sm:$0xff] %v2554_v40  ;;  %808 = vadd.xlane.f32.xlu1 %v807_v22  ;;  %v719_v22 = vmul.f32 %v2373_v59, %v2017_v21 }
 0x179   :  { %v2558_v7 = vpop.xlane.xlu2 %484 }
 0x17a   :  { %3698 = vst [vmem:[#allocation33_spill] sm:$0xff] %v2558_v7  ;;  %v759_v24 = vsel %vm162_vm0, %v719_v22, 0.0  ;;  %v744_v22 = vmul.f32 %v2373_v59, %v2222_v54 }
 0x17f   :  { %751 = vadd.xlane.f32.xlu2 %v750_v18  ;;  %v2564_v9 = vpop.xlane.xlu0 %778 }
 0x180   :  { %817 = vadd.xlane.f32.xlu1 %v816_v1  ;;  %v2566_v47 = vpop.permute.xlu1 %283  ;;  %v721_v1 = vmul.f32 %v2373_v59, %v2033_v27 }
 0x181   :  { %v2570_v41 = vpop.xlane.xlu2 %493 }
 0x182   :  { %3699 = vst [vmem:[#allocation34_spill] sm:$0xff] %v2570_v41 }
 0x187   :  { %760 = vadd.xlane.f32.xlu2 %v759_v24  ;;  %v2576_v57 = vpop.xlane.xlu0 %787  ;;  %v765_v24 = vsel %vm162_vm0, %v721_v1, 0.0 }
 0x188   :  { %3700 = vst [vmem:[#allocation35_spill] sm:$0xff] %v2576_v57  ;;  %826 = vadd.xlane.f32.xlu1 %v825_v58  ;;  %v2578_v18 = vpop.permute.xlu1 %576  ;;  %v834_v58 = vsel %vm162_vm0, %v744_v22, 0.0  ;;  %v2593_v57 = vperm.slane %v1985_v10, 3  ;;  %v727_v10 = vmul.f32 %v2373_v59, %v2081_v45 }
 0x189   :  { %v601_v21 = vadd.f32 %v2578_v18, %v515_v28  ;;  %v605_v7 = vadd.f32 %v2578_v18, %v527_v39  ;;  %v613_v41 = vadd.f32 %v2578_v18, %v551_v14  ;;  %v503_v37 = vpop.xlane.xlu2 %502  ;;  %v724_v14 = vmul.f32 %v2373_v59, %v2054_v34 }
 0x18a   :  { %v2588_v16 = vadd.f32 %v2578_v18, %v503_v37  ;;  %v1008_v54 = vmul.f32 %v2593_v57, %v2161_v20 }
 0x18b   :  { %v774_v37 = vsel %vm162_vm0, %v724_v14, 0.0  ;;  %v730_v14 = vmul.f32 %v2373_v59, %v2102_v52 }
 0x18c   :  { %v1044_v1 = vsel %vm162_vm0, %v1008_v54, 0.0  ;;  %v296_v54 = vadd.f32 %v2566_v47, %v2294_v61  ;;  %v292_v61 = vadd.f32 %v2566_v47, %v2303_v17 }
 0x18e   :  { %1626 = vtanh.f32 %v296_v54 }
 0x18f   :  { %766 = vadd.xlane.f32.xlu2 %v765_v24  ;;  %v2595_v28 = vpop.xlane.xlu0 %796 }
 0x190   :  { %3701 = vst [vmem:[#allocation36_spill] sm:$0xff] %v2595_v28  ;;  %835 = vadd.xlane.f32.xlu1 %v834_v58  ;;  %v1012_v58 = vmul.f32 %v2593_v57, %v2033_v27  ;;  %v783_v28 = vsel %vm162_vm0, %v727_v10, 0.0  ;;  %v312_v27 = vadd.f32 %v2566_v47, %v2395_v19  ;;  %v320_v10 = vadd.f32 %v2566_v47, %v2499_v26 }
 0x191   :  { %v2599_v39 = vpop.xlane.xlu2 %511  ;;  %v589_v19 = vadd.f32 %v2578_v18, %v2457_v0  ;;  %v733_v26 = vmul.f32 %v2373_v59, %v2129_v63  ;;  %v1018_v0 = vmul.f32 %v2593_v57, %v2081_v45 }
 0x192   :  { %v1056_v20 = vsel %vm162_vm0, %v1012_v58, 0.0  ;;  %v792_v58 = vsel %vm162_vm0, %v730_v14, 0.0 }
 0x193   :  { %v801_v54 = vsel %vm162_vm0, %v733_v26, 0.0 }
 0x197   :  { %775 = vadd.xlane.f32.xlu2 %v774_v37  ;;  %v2607_v22 = vpop.xlane.xlu0 %805 }
 0x198   :  { %3702 = vst [vmem:[#allocation37_spill] sm:$0xff] %v2607_v22 }
 0x199   :  { %v2609_v24 = vpop.xlane.xlu2 %520 }
 0x19a   :  { %3703 = vst [vmem:[#allocation38_spill] sm:$0xff] %v2609_v24  ;;  %1045 = vadd.xlane.f32.xlu0 %v1044_v1  ;;  %v308_v24 = vadd.f32 %v2566_v47, %v2369_v6  ;;  %v300_v6 = vadd.f32 %v2566_v47, %v2322_v42  ;;  %v1627_v42 = vpop.eup %1626 }
 0x19c   :  { %1628 = vtanh.f32 %v308_v24  ;;  %v304_v24 = vadd.f32 %v2566_v47, %v2340_v30  ;;  %v1074_v30 = vsel %vm162_vm0, %v1018_v0, 0.0 }
 0x19d   :  { %1630 = vtanh.f32 %v312_v27 }
 0x19e   :  { %1632 = vtanh.f32 %v320_v10 }
 0x19f   :  { %784 = vadd.xlane.f32.xlu2 %v783_v28  ;;  %v2623_v1 = vpop.xlane.xlu0 %814  ;;  %v1015_v28 = vmul.f32 %v2593_v57, %v2054_v34  ;;  %1634 = vtanh.f32 %v292_v61  ;;  %v585_v61 = vadd.f32 %v2578_v18, %v2447_v60 }
 0x1a0   :  { %1636 = vtanh.f32 %v300_v6 }
 0x1a1   :  { %v2619_v37 = vpop.xlane.xlu2 %529  ;;  %v1065_v34 = vsel %vm162_vm0, %v1015_v28, 0.0  ;;  %1638 = vtanh.f32 %v589_v19  ;;  %v316_v28 = vadd.f32 %v2566_v47, %v2416_v56  ;;  %v736_v19 = vmul.f32 %v2373_v59, %v2150_v13 }
 0x1a2   :  { %3704 = vst [vmem:[#allocation39_spill] sm:$0xff] %v2619_v37  ;;  %1057 = vadd.xlane.f32.xlu0 %v1056_v20  ;;  %v1629_v14 = vpop.eup %1628  ;;  %1640 = vtanh.f32 %v601_v21  ;;  %v593_v21 = vadd.f32 %v2578_v18, %v2484_v38  ;;  %v1021_v38 = vmul.f32 %v2593_v57, %v2102_v52 }
 0x1a3   :  { %v1631_v10 = vpop.eup %1630  ;;  %1642 = vtanh.f32 %v605_v7  ;;  %v378_v52 = vmul.f32 %v1629_v14, %v2520_v36 }
 0x1a4   :  { %1644 = vtanh.f32 %v613_v41 }
 0x1a5   :  { %1646 = vtanh.f32 %v304_v24 }
 0x1a6   :  { %1648 = vtanh.f32 %v316_v28  ;;  %v366_v28 = vmul.f32 %v1627_v42, %v2520_v36  ;;  %v1024_v42 = vmul.f32 %v2593_v57, %v2129_v63 }
 0x1a7   :  { %793 = vadd.xlane.f32.xlu2 %v792_v58  ;;  %v2648_v27 = vpop.xlane.xlu0 %823  ;;  %v1633_v58 = vpop.eup %1632  ;;  %1650 = vtanh.f32 %v2588_v16  ;;  %v739_v16 = vmul.f32 %v2373_v59, %v2185_v35 }
 0x1a8   :  { %3705 = vst [vmem:[#allocation40_spill] sm:$0xff] %v2648_v27  ;;  %v1635_v45 = vpop.eup %1634  ;;  %1652 = vtanh.f32 %v585_v61 }
 0x1a9   :  { %265 = vperm.xlu1 %1612, %v2286_v49   ;;  %v539_v20 = vpop.xlane.xlu2 %538  ;;  %v1637_v6 = vpop.eup %1636  ;;  %1654 = vtanh.f32 %v593_v21  ;;  %v382_v21 = vmul.f32 %v1631_v10, %v2520_v36 }
 0x1aa   :  { %1066 = vadd.xlane.f32.xlu0 %v1065_v34  ;;  %v609_v17 = vadd.f32 %v2578_v18, %v539_v20  ;;  %v1639_v56 = vpop.eup %1638  ;;  %v810_v34 = vsel %vm162_vm0, %v736_v19, 0.0  ;;  %v390_v19 = vmul.f32 %v1633_v58, %v2520_v36 }
 0x1ab   :  { %v1641_v60 = vpop.eup %1640 }
 0x1ac   :  { %v1643_v7 = vpop.eup %1642  ;;  %1656 = vtanh.f32 %v609_v17  ;;  %v362_v17 = vmul.f32 %v1635_v45, %v2520_v36 }
 0x1ad   :  { %v1645_v18 = vpop.eup %1644 }
 0x1ae   :  { %v1647_v26 = vpop.eup %1646 }
 0x1af   :  { %802 = vadd.xlane.f32.xlu2 %v801_v54  ;;  %v1649_v20 = vpop.eup %1648  ;;  %v2670_v0 = vpop.xlane.xlu0 %832  ;;  %v1083_v54 = vsel %vm162_vm0, %v1021_v38, 0.0  ;;  %v819_v38 = vsel %vm162_vm0, %v739_v16, 0.0  ;;  %v374_v14 = vmul.f32 %v1647_v26, %v2520_v36 }
 0x1b0   :  { %3707 = vst [vmem:[#allocation42_spill] sm:$0xff] %v2670_v0  ;;  %v1651_v24 = vpop.eup %1650  ;;  %v386_v45 = vmul.f32 %v1649_v20, %v2520_v36 }
 0x1b1   :  { %558 = vperm.xlu1 %1612, %v2425_v29   ;;  %v2661_v41 = vpop.xlane.xlu2 %547  ;;  %v1653_v61 = vpop.eup %1652 }
 0x1b2   :  { %1075 = vadd.xlane.f32.xlu0 %v1074_v30  ;;  %v370_v30 = vmul.f32 %v1637_v6, %v2520_v36  ;;  %v1655_v27 = vpop.eup %1654 }
 0x1b3   :  { %v2663_v47 = vpop.xlane.xlu1 %748 }
 0x1b4   :  { %3706 = vst [vmem:[#allocation41_spill] sm:$0xff] %v2663_v47 }
 0x1b7   :  { %811 = vadd.xlane.f32.xlu2 %v810_v34  ;;  %v1657_v34 = vpop.eup %1656 }
 0x1b9   :  { %849 = vperm.xlu1 %1612, %v2526_v33   ;;  %v2680_v0 = vpop.permute.xlu2 %647 }
 0x1ba   :  { %1084 = vadd.xlane.f32.xlu0 %v1083_v54  ;;  %v653_v10 = vmul.f32 %v1653_v61, %v2680_v0  ;;  %v661_v58 = vmul.f32 %v1655_v27, %v2680_v0  ;;  %v657_v6 = vmul.f32 %v1639_v56, %v2680_v0  ;;  %v665_v37 = vmul.f32 %v1651_v24, %v2680_v0 }
 0x1bb   :  { %v2691_v47 = vpop.xlane.xlu1 %757  ;;  %v669_v16 = vmul.f32 %v1641_v60, %v2680_v0  ;;  %v677_v63 = vmul.f32 %v1657_v34, %v2680_v0  ;;  %v673_v26 = vmul.f32 %v1643_v7, %v2680_v0  ;;  %v681_v20 = vmul.f32 %v1645_v18, %v2680_v0 }
 0x1bc   :  { %v2697_v22 = vadd.f32 %v653_v10, %v362_v17  ;;  %v2699_v54 = vadd.f32 %v661_v58, %v370_v30  ;;  %v2701_v61 = vadd.f32 %v657_v6, %v366_v28  ;;  %v2703_v27 = vadd.f32 %v665_v37, %v374_v14  ;;  %v2715_v17 = vpop.xlane.xlu0 %841 }
 0x1bd   :  { %v2705_v56 = vadd.f32 %v669_v16, %v378_v52  ;;  %v2707_v24 = vadd.f32 %v677_v63, %v386_v45  ;;  %v2709_v40 = vadd.f32 %v673_v26, %v382_v21  ;;  %v2711_v60 = vadd.f32 %v681_v20, %v390_v19 }
 0x1be   :  { %v269_v7 = vadd.s32 8, %v2206_v48  ;;  %v1092_v18 = vsel %vm162_vm0, %v1024_v42, 0.0  ;;  %v742_v28 = vmul.f32 %v2373_v59, %v2212_v50  ;;  %v3711_v37 = vmov 2  }
 0x1bf   :  { %3708 = vst [vmem:[#allocation43_spill] sm:$0xff] %v2707_v24  ;;  %820 = vadd.xlane.f32.xlu2 %v819_v38  ;;  %v1027_v30 = vmul.f32 %v2593_v57, %v2150_v13  ;;  %v291_v38 = vadd.f32 %v2507_v53, %v2393_v4  ;;  %v745_v42 = vmul.f32 %v2373_v59, %v2241_v5 }
 0x1c0   :  { %3709 = vst [vmem:[#allocation44_spill] sm:$0xff] %v2709_v40  ;;  %1613 = vset.pattern.permute.xlu2 %v269_v7  ;;  %1617 = vset.pattern.permute.xlu0 %v269_v7  ;;  %v828_v21 = vsel %vm162_vm0, %v742_v28, 0.0  ;;  %v1030_v45 = vmul.f32 %v2593_v57, %v2185_v35  ;;  %v1033_v10 = vmul.f32 %v2593_v57, %v2212_v50  ;;  %v1898_v50 = vld [vmem:[%s3655_s1 + $0x8] sm:$0xff] }
 0x1c1   :  { %3710 = vst [vmem:[#allocation45_spill] sm:$0xff] %v2711_v60  ;;  %1616 = vset.pattern.permute.xlu1 %v3711_v37  ;;  %v1101_v19 = vsel %vm162_vm0, %v1027_v30, 0.0  ;;  %1658 = vtanh.f32 %v291_v38  ;;  %v837_v59 = vsel %vm162_vm0, %v745_v42, 0.0  ;;  %v1036_v63 = vmul.f32 %v2593_v57, %v2241_v5  ;;  %v1899_v5 = vld [vmem:[%s3655_s1 + $0x20] sm:$0xff] }
 0x1c2   :  { %1093 = vadd.xlane.f32.xlu0 %v1092_v18  ;;  %938 = vperm.xlu1 %1616, %v2300_v3   ;;  %v1119_v16 = vsel %vm162_vm0, %v1033_v10, 0.0  ;;  %v1007_v7 = vmul.f32 %v1898_v50, %v2593_v57  ;;  %v1010_v37 = vmul.f32 %v1899_v5, %v2593_v57  ;;  %v299_v10 = vadd.f32 %v2507_v53, %v2360_v32 }
 0x1c3   :  { %v2721_v52 = vpop.xlane.xlu1 %763  ;;  %v1128_v26 = vsel %vm162_vm0, %v1036_v63, 0.0  ;;  %v315_v63 = vadd.f32 %v2507_v53, %v2405_v43  ;;  %v311_v32 = vadd.f32 %v2507_v53, %v2453_v2 }
 0x1c4   :  { %3712 = vst [vmem:[#allocation46_spill] sm:$0xff] %v2721_v52  ;;  %v1041_v18 = vsel %vm162_vm0, %v1007_v7, 0.0  ;;  %v1050_v30 = vsel %vm162_vm0, %v1010_v37, 0.0 }
 0x1c7   :  { %829 = vadd.xlane.f32.xlu2 %v828_v21 }
 0x1ca   :  { %1102 = vadd.xlane.f32.xlu0 %v1101_v19  ;;  %v2731_v14 = vpop.permute.xlu0 %570  ;;  %1619 = vset.pattern.permute.xlu1 %v2225_v55  ;;  %v1110_v55 = vsel %vm162_vm0, %v1030_v45, 0.0 }
 0x1cb   :  { %v584_v3 = vadd.f32 %v2731_v14, %v2445_v44  ;;  %v2738_v13 = vadd.f32 %v2731_v14, %v2599_v39  ;;  %v2744_v4 = vadd.f32 %v2731_v14, %v2661_v41  ;;  %v2747_v34 = vpop.xlane.xlu1 %772  ;;  %v1659_v44 = vpop.eup %1658  ;;  %v604_v43 = vadd.f32 %v2731_v14, %v2509_v23  ;;  %v1903_v23 = vld [vmem:[%s3655_s1 + $0x80] sm:$0xff] }
 0x1cc   :  { %v361_v35 = vmul.f32 %v1659_v44, %v2520_v36  ;;  %v295_v44 = vadd.f32 %v2507_v53, %v2330_v62  ;;  %v1022_v37 = vmul.f32 %v1903_v23, %v2593_v57 }
 0x1cd   :  { %1660 = vtanh.f32 %v584_v3  ;;  %v2792_v3 = vperm.slane %v2276_v11, 3  ;;  %v303_v11 = vadd.f32 %v2507_v53, %v2389_v8  ;;  %v3717_v8 = vmov 0  }
 0x1ce   :  { %1662 = vtanh.f32 %v295_v44 }
 0x1cf   :  { %838 = vadd.xlane.f32.xlu2 %v837_v59  ;;  %3715 = vst [vmem:[#allocation49_spill] sm:$0xff] %v2792_v3  ;;  %v1901_v59 = vld [vmem:[%s3655_s1 + $0x50] sm:$0xff]  ;;  %1664 = vtanh.f32 %v303_v11 }
 0x1d0   :  { %1666 = vtanh.f32 %v299_v10 }
 0x1d2   :  { %1111 = vadd.xlane.f32.xlu0 %v1110_v55  ;;  %v2794_v45 = vpop.permute.xlu0 %861  ;;  %v1016_v55 = vmul.f32 %v1901_v59, %v2593_v57 }
 0x1d3   :  { %v1661_v39 = vpop.eup %1660  ;;  %v2756_v6 = vpop.xlane.xlu1 %781  ;;  %3716 = vst [vmem:[#allocation50_spill] sm:$0xff] %v2794_v45 }
 0x1d4   :  { %v652_v58 = vmul.f32 %v1661_v39, %v2680_v0  ;;  %v2834_v5 = vpop.eup %1662 }
 0x1d5   :  { %v2836_v2 = vpop.eup %1664 }
 0x1d6   :  { %v2754_v41 = vadd.f32 %v652_v58, %v361_v35  ;;  %v307_v35 = vadd.f32 %v2507_v53, %v2421_v31  ;;  %v588_v31 = vadd.f32 %v2731_v14, %v2547_v51  ;;  %v2840_v51 = vpop.eup %1666 }
 0x1d8   :  { %1668 = vtanh.f32 %v307_v35 }
 0x1d9   :  { %1670 = vtanh.f32 %v315_v63 }
 0x1da   :  { %1120 = vadd.xlane.f32.xlu0 %v1119_v16  ;;  %v1902_v16 = vld [vmem:[%s3655_s1 + $0x68] sm:$0xff]  ;;  %1672 = vtanh.f32 %v311_v32 }
 0x1db   :  { %v2762_v20 = vpop.xlane.xlu1 %790  ;;  %v1019_v62 = vmul.f32 %v1902_v16, %v2593_v57  ;;  %1674 = vtanh.f32 %v588_v31  ;;  %v3721_v16 = vld [vmem:[#allocation32_spill] sm:$0xff] }
 0x1dd   :  { %v1077_v7 = vsel %vm162_vm0, %v1019_v62, 0.0 }
 0x1e2   :  { %1129 = vadd.xlane.f32.xlu0 %v1128_v26  ;;  %v2814_v58 = vpop.permute.xlu0 %867  ;;  %v592_v26 = vadd.f32 %v2731_v14, %v2467_v46  ;;  %v596_v46 = vadd.f32 %v2731_v14, %v2497_v25  ;;  %v875_v25 = vadd.f32 %v2794_v45, %v2544_v12  ;;  %v1086_v12 = vsel %vm162_vm0, %v1022_v37, 0.0 }
 0x1e3   :  { %v2770_v28 = vpop.xlane.xlu1 %799  ;;  %v880_v62 = vadd.f32 %v2814_v58, %v3721_v16  ;;  %v365_v16 = vmul.f32 %v2834_v5, %v2520_v36 }
 0x1e4   :  { %3713 = vst [vmem:[#allocation47_spill] sm:$0xff] %v2770_v28  ;;  %1676 = vtanh.f32 %v592_v26  ;;  %v3724_v26 = vld [vmem:[#allocation37_spill] sm:$0xff]  ;;  %v3737_v28 = vld [vmem:[#allocation24_spill] sm:$0xff] }
 0x1e5   :  { %1678 = vtanh.f32 %v2738_v13  ;;  %v883_v13 = vadd.f32 %v2794_v45, %v2564_v9 }
 0x1e6   :  { %1680 = vtanh.f32 %v604_v43 }
 0x1e7   :  { %564 = vperm.xlu2 %1613, %v2425_v29   ;;  %v1900_v29 = vld [vmem:[%s3655_s1 + $0x38] sm:$0xff]  ;;  %1682 = vtanh.f32 %v2744_v4  ;;  %v1904_v4 = vld [vmem:[%s3655_s1] sm:$0xff] }
 0x1e8   :  { %v1013_v38 = vmul.f32 %v1900_v29, %v2593_v57  ;;  %v608_v29 = vadd.f32 %v2731_v14, %v2541_v15  ;;  %1684 = vtanh.f32 %v596_v46  ;;  %v887_v14 = vadd.f32 %v2794_v45, %v2762_v20 }
 0x1e9   :  { %v1006_v9 = vmul.f32 %v1904_v4, %v2593_v57  ;;  %v884_v20 = vadd.f32 %v2814_v58, %v2756_v6  ;;  %v904_v46 = vadd.f32 %v2814_v58, %v2715_v17  ;;  %v1906_v17 = vld [vmem:[%s3655_s1 + $0x18] sm:$0xff] }
 0x1ea   :  { %v1059_v42 = vsel %vm162_vm0, %v1013_v38, 0.0  ;;  %v2851_v38 = vpop.eup %1668  ;;  %1686 = vtanh.f32 %v608_v29 }
 0x1eb   :  { %v2780_v19 = vpop.xlane.xlu1 %808  ;;  %1688 = vtanh.f32 %v875_v25  ;;  %v1038_v32 = vsel %vm162_vm0, %v1006_v9, 0.0  ;;  %v3725_v9 = vld [vmem:[#allocation16_spill] sm:$0xff] }
 0x1ec   :  { %1042 = vadd.xlane.f32.xlu1 %v1041_v18  ;;  %1690 = vtanh.f32 %v883_v13 }
 0x1ef   :  { %855 = vperm.xlu2 %1613, %v2526_v33  }
 0x1f2   :  { %v2778_v21 = vpop.xlane.xlu2 %751 }
 0x1f3   :  { %3714 = vst [vmem:[#allocation48_spill] sm:$0xff] %v2778_v21 }
 0x1f4   :  { %1051 = vadd.xlane.f32.xlu1 %v1050_v30 }
 0x1f6   :  { %271 = vperm.xlu0 %1617, %v2286_v49   ;;  %v2801_v49 = vpop.xlane.xlu1 %817 }
 0x1f7   :  { %1618 = vset.pattern.permute.xlu2 %v2206_v48  ;;  %v1068_v48 = vsel %vm162_vm0, %v1016_v55, 0.0  ;;  %v895_v55 = vadd.f32 %v2794_v45, %v2623_v1  ;;  %v876_v1 = vadd.f32 %v2814_v58, %v2691_v47  ;;  %v1905_v47 = vld [vmem:[%s3655_s1 + $0x98] sm:$0xff]  ;;  %v896_v37 = vadd.f32 %v2814_v58, %v2801_v49 }
 0x1f8   :  { %v1025_v31 = vmul.f32 %v1905_v47, %v2593_v57  ;;  %v1009_v49 = vmul.f32 %v1906_v17, %v2593_v57 }
 0x1f9   :  { %1692 = vtanh.f32 %v895_v55 }
 0x1fa   :  { %v2789_v33 = vpop.xlane.xlu2 %760  ;;  %1694 = vtanh.f32 %v887_v14  ;;  %v1095_v14 = vsel %vm162_vm0, %v1025_v31, 0.0  ;;  %v3727_v31 = vld [vmem:[#allocation6_spill] sm:$0xff]  ;;  %v1047_v5 = vsel %vm162_vm0, %v1009_v49, 0.0 }
 0x1fb   :  { %1696 = vtanh.f32 %v876_v1  ;;  %v2922_v1 = vadd.f32 %v2507_v53, %v3725_v9 }
 0x1fc   :  { %1060 = vadd.xlane.f32.xlu1 %v1059_v42  ;;  %v2855_v42 = vpop.eup %1670  ;;  %1698 = vtanh.f32 %v884_v20 }
 0x1fd   :  { %v2860_v59 = vpop.eup %1672  ;;  %1700 = vtanh.f32 %v880_v62 }
 0x1fe   :  { %1146 = vperm.xlu0 %1617, %v2792_v3   ;;  %v827_v50 = vpop.xlane.xlu1 %826  ;;  %v1675_v15 = vpop.eup %1674 }
 0x1ff   :  { %v1677_v44 = vpop.eup %1676  ;;  %v899_v25 = vadd.f32 %v2794_v45, %v827_v50  ;;  %v656_v53 = vmul.f32 %v1675_v15, %v2680_v0  ;;  %v3730_v15 = vld [vmem:[#allocation14_spill] sm:$0xff] }
 0x200   :  { %v2877_v10 = vpop.eup %1678 }
 0x201   :  { %v2881_v35 = vpop.eup %1680 }
 0x202   :  { %v2806_v39 = vpop.xlane.xlu2 %766  ;;  %v2885_v63 = vpop.eup %1682 }
 0x203   :  { %3722 = vst [vmem:[#allocation32_spill] sm:$0xff] %v2885_v63  ;;  %v2896_v43 = vpop.eup %1684  ;;  %v879_v55 = vadd.f32 %v2794_v45, %v2806_v39  ;;  %v3741_v63 = vld [vmem:[#allocation8_spill] sm:$0xff] }
 0x204   :  { %1069 = vadd.xlane.f32.xlu1 %v1068_v48  ;;  %v2900_v23 = vpop.eup %1686 }
 0x205   :  { %v2904_v29 = vpop.eup %1688 }
 0x206   :  { %1624 = vset.pattern.permute.xlu0 %v3717_v8  ;;  %v2866_v48 = vpop.xlane.xlu1 %835  ;;  %v2907_v13 = vpop.eup %1690 }
 0x207   :  { %3720 = vst [vmem:[#allocation53_spill] sm:$0xff] %v2866_v48 }
 0x20a   :  { %v2832_v18 = vpop.xlane.xlu2 %775 }
 0x20b   :  { %3718 = vst [vmem:[#allocation51_spill] sm:$0xff] %v2832_v18  ;;  %v3739_v18 = vld [vmem:[#allocation27_spill] sm:$0xff] }
 0x20c   :  { %1078 = vadd.xlane.f32.xlu1 %v1077_v7  ;;  %v892_v7 = vadd.f32 %v2814_v58, %v3724_v26 }
 0x20d   :  { %v2847_v30 = vpop.xlane.xlu0 %1045 }
 0x20e   :  { %3719 = vst [vmem:[#allocation52_spill] sm:$0xff] %v2847_v30  ;;  %1702 = vtanh.f32 %v892_v7 }
 0x20f   :  { %1704 = vtanh.f32 %v904_v46  ;;  %v3728_v46 = vld [vmem:[#allocation11_spill] sm:$0xff] }
 0x210   :  { %1706 = vtanh.f32 %v896_v37 }
 0x211   :  { %1708 = vtanh.f32 %v899_v25  ;;  %v1907_v25 = vld [vmem:[%s3655_s1 + $0xb0] sm:$0xff] }
 0x212   :  { %v2873_v11 = vpop.xlane.xlu2 %784  ;;  %1710 = vtanh.f32 %v879_v55  ;;  %v1028_v17 = vmul.f32 %v1907_v25, %v2593_v57  ;;  %v373_v55 = vmul.f32 %v2836_v2, %v2520_v36  ;;  %v369_v25 = vmul.f32 %v2840_v51, %v2520_v36 }
 0x213   :  { %v385_v2 = vmul.f32 %v2855_v42, %v2520_v36 }
 0x214   :  { %1087 = vadd.xlane.f32.xlu1 %v1086_v12  ;;  %v2916_v12 = vpop.eup %1692  ;;  %v1104_v51 = vsel %vm162_vm0, %v1028_v17, 0.0 }
 0x215   :  { %v2892_v6 = vpop.xlane.xlu0 %1057  ;;  %v2918_v50 = vpop.eup %1694 }
 0x216   :  { %3723 = vst [vmem:[#allocation54_spill] sm:$0xff] %v2892_v6  ;;  %v2929_v62 = vpop.eup %1696 }
 0x217   :  { %v2936_v7 = vpop.eup %1698 }
 0x218   :  { %1039 = vadd.xlane.f32.xlu2 %v1038_v32  ;;  %v3726_v32 = vld [vmem:[#allocation4_spill] sm:$0xff]  ;;  %v2947_v9 = vpop.eup %1700 }
 0x219   :  { %v2954_v49 = vpop.eup %1702 }
 0x21a   :  { %v794_v4 = vpop.xlane.xlu2 %793 }
 0x21b   :  { %v888_v39 = vadd.f32 %v2814_v58, %v794_v4  ;;  %v2925_v20 = vpop.permute.xlu1 %265 }
 0x21c   :  { %v289_v47 = vadd.f32 %v2925_v20, %v3726_v32  ;;  %v293_v26 = vadd.f32 %v2925_v20, %v3727_v31  ;;  %1096 = vadd.xlane.f32.xlu1 %v1095_v14  ;;  %v301_v37 = vadd.f32 %v2925_v20, %v3728_v46  ;;  %v305_v14 = vadd.f32 %v2925_v20, %v3730_v15  ;;  %v3731_v31 = vld [vmem:[#allocation18_spill] sm:$0xff]  ;;  %v3733_v15 = vld [vmem:[#allocation23_spill] sm:$0xff] }
 0x21d   :  { %v2945_v4 = vpop.xlane.xlu0 %1066  ;;  %1712 = vtanh.f32 %v888_v39  ;;  %v660_v32 = vmul.f32 %v1677_v44, %v2680_v0  ;;  %v309_v46 = vadd.f32 %v2925_v20, %v3731_v31  ;;  %v377_v39 = vmul.f32 %v2851_v38, %v2520_v36  ;;  %v1908_v38 = vld [vmem:[%s3655_s1 + $0x28] sm:$0xff] }
 0x21e   :  { %3729 = vst [vmem:[#allocation37_spill] sm:$0xff] %v2945_v4  ;;  %1714 = vtanh.f32 %v289_v47  ;;  %v2962_v4 = vpop.eup %1704  ;;  %v317_v6 = vadd.f32 %v2925_v20, %v3733_v15  ;;  %v2970_v44 = vmul.f32 %v2860_v59, %v2520_v36  ;;  %v1011_v31 = vmul.f32 %v1908_v38, %v2593_v57 }
 0x21f   :  { %3732 = vst [vmem:[#allocation16_spill] sm:$0xff] %v2962_v4  ;;  %1716 = vtanh.f32 %v293_v26  ;;  %v2972_v47 = vpop.eup %1706  ;;  %v2979_v26 = vadd.f32 %v656_v53, %v365_v16  ;;  %v664_v59 = vmul.f32 %v2896_v43, %v2680_v0  ;;  %v2985_v15 = vadd.f32 %v660_v32, %v369_v25  ;;  %v1909_v16 = vld [vmem:[%s3655_s1 + $0xc8] sm:$0xff] }
 0x220   :  { %1048 = vadd.xlane.f32.xlu2 %v1047_v5  ;;  %1718 = vtanh.f32 %v301_v37  ;;  %v2981_v5 = vpop.eup %1708  ;;  %v668_v37 = vmul.f32 %v2877_v10, %v2680_v0  ;;  %v1031_v53 = vmul.f32 %v1909_v16, %v2593_v57  ;;  %v676_v43 = vmul.f32 %v2900_v23, %v2680_v0  ;;  %v3734_v10 = vld [vmem:[#allocation17_spill] sm:$0xff] }
 0x221   :  { %1720 = vtanh.f32 %v305_v14  ;;  %v2989_v17 = vpop.eup %1710  ;;  %v1053_v23 = vsel %vm162_vm0, %v1011_v31, 0.0 }
 0x222   :  { %v803_v42 = vpop.xlane.xlu2 %802  ;;  %1722 = vtanh.f32 %v309_v46  ;;  %v3735_v46 = vld [vmem:[#allocation30_spill] sm:$0xff]  ;;  %v3031_v21 = vadd.f32 %v668_v37, %v377_v39  ;;  %v3036_v24 = vadd.f32 %v676_v43, %v385_v2  ;;  %v3742_v39 = vld [vmem:[#allocation20_spill] sm:$0xff]  ;;  %v1913_v2 = vld [vmem:[%s3655_s1 + $0xf8] sm:$0xff] }
 0x223   :  { %v891_v30 = vadd.f32 %v2794_v45, %v803_v42  ;;  %v2992_v38 = vpop.permute.xlu1 %558  ;;  %v3000_v14 = vpop.eup %1712  ;;  %1724 = vtanh.f32 %v317_v6  ;;  %v3736_v42 = vld [vmem:[#allocation34_spill] sm:$0xff]  ;;  %v1914_v43 = vld [vmem:[%s3655_s1 + $0x70] sm:$0xff] }
 0x224   :  { %v582_v32 = vadd.f32 %v2992_v38, %v3734_v10  ;;  %v586_v25 = vadd.f32 %v2992_v38, %v3735_v46  ;;  %v594_v8 = vadd.f32 %v2992_v38, %v3736_v42  ;;  %1105 = vadd.xlane.f32.xlu1 %v1104_v51  ;;  %v1715_v48 = vpop.eup %1714  ;;  %v598_v16 = vadd.f32 %v2992_v38, %v3737_v28  ;;  %v1910_v6 = vld [vmem:[%s3655_s1 + $0x40] sm:$0xff] }
 0x225   :  { %1726 = vtanh.f32 %v891_v30  ;;  %v3011_v3 = vpop.xlane.xlu0 %1075  ;;  %v1014_v10 = vmul.f32 %v1910_v6, %v2593_v57  ;;  %v1717_v46 = vpop.eup %1716  ;;  %v602_v42 = vadd.f32 %v2992_v38, %v3739_v18  ;;  %v1911_v30 = vld [vmem:[%s3655_s1 + $0xe0] sm:$0xff]  ;;  %v3025_v51 = vmul.f32 %v2881_v35, %v2680_v0 }
 0x226   :  { %3738 = vst [vmem:[#allocation4_spill] sm:$0xff] %v3011_v3  ;;  %1728 = vtanh.f32 %v582_v32  ;;  %v1034_v28 = vmul.f32 %v1911_v30, %v2593_v57  ;;  %v1719_v31 = vpop.eup %1718  ;;  %v3740_v3 = vld [vmem:[#allocation28_spill] sm:$0xff]  ;;  %v3029_v6 = vadd.f32 %v664_v59, %v373_v55  ;;  %v1113_v32 = vsel %vm162_vm0, %v1031_v53, 0.0 }
 0x227   :  { %v610_v52 = vadd.f32 %v2992_v38, %v3740_v3  ;;  %1730 = vtanh.f32 %v586_v25  ;;  %v1721_v18 = vpop.eup %1720  ;;  %v297_v30 = vadd.f32 %v2925_v20, %v3741_v63  ;;  %v1062_v60 = vsel %vm162_vm0, %v1014_v10, 0.0  ;;  %v1912_v3 = vld [vmem:[%s3655_s1 + $0x58] sm:$0xff] }
 0x228   :  { %1732 = vtanh.f32 %v594_v8  ;;  %1054 = vadd.xlane.f32.xlu2 %v1053_v23  ;;  %v1723_v35 = vpop.eup %1722  ;;  %v1017_v55 = vmul.f32 %v1912_v3, %v2593_v57  ;;  %v590_v8 = vadd.f32 %v2992_v38, %v3742_v39  ;;  %v1122_v63 = vsel %vm162_vm0, %v1034_v28, 0.0  ;;  %v3744_v28 = vld [vmem:[#allocation13_spill] sm:$0xff] }
 0x229   :  { %1734 = vtanh.f32 %v598_v16  ;;  %v1725_v59 = vpop.eup %1724  ;;  %v1037_v53 = vmul.f32 %v1913_v2, %v2593_v57  ;;  %v1020_v25 = vmul.f32 %v1914_v43, %v2593_v57  ;;  %v359_v10 = vmul.f32 %v1715_v48, %v2520_v36  ;;  %v3745_v2 = vld [vmem:[#allocation41_spill] sm:$0xff] }
 0x22a   :  { %1736 = vtanh.f32 %v602_v42  ;;  %v3045_v37 = vpop.xlane.xlu2 %811  ;;  %v363_v42 = vmul.f32 %v1717_v46, %v2520_v36  ;;  %v313_v3 = vadd.f32 %v2925_v20, %v3744_v28  ;;  %v3747_v46 = vld [vmem:[#allocation39_spill] sm:$0xff] }
 0x22b   :  { %3743 = vst [vmem:[#allocation6_spill] sm:$0xff] %v3045_v37  ;;  %v3056_v16 = vpop.eup %1726  ;;  %1738 = vtanh.f32 %v610_v52  ;;  %v3058_v23 = vpop.permute.xlu1 %849 }
 0x22c   :  { %v1729_v39 = vpop.eup %1728  ;;  %1114 = vadd.xlane.f32.xlu1 %v1113_v32  ;;  %v873_v37 = vadd.f32 %v3058_v23, %v3745_v2  ;;  %v877_v43 = vadd.f32 %v3058_v23, %v2789_v33  ;;  %1740 = vtanh.f32 %v297_v30  ;;  %v881_v52 = vadd.f32 %v3058_v23, %v2747_v34  ;;  %v3748_v30 = vld [vmem:[#allocation36_spill] sm:$0xff] }
 0x22d   :  { %v1731_v45 = vpop.eup %1730  ;;  %v3070_v40 = vpop.xlane.xlu0 %1084  ;;  %v650_v48 = vmul.f32 %v1729_v39, %v2680_v0  ;;  %1742 = vtanh.f32 %v590_v8  ;;  %v885_v20 = vadd.f32 %v3058_v23, %v2873_v11  ;;  %v606_v32 = vadd.f32 %v2992_v38, %v3747_v46 }
 0x22e   :  { %3746 = vst [vmem:[#allocation11_spill] sm:$0xff] %v3070_v40  ;;  %v1733_v28 = vpop.eup %1732  ;;  %1744 = vtanh.f32 %v873_v37  ;;  %v654_v33 = vmul.f32 %v1731_v45, %v2680_v0  ;;  %v889_v2 = vadd.f32 %v3058_v23, %v3748_v30  ;;  %v3082_v34 = vadd.f32 %v3058_v23, %v2780_v19 }
 0x22f   :  { %v1735_v40 = vpop.eup %1734  ;;  %v682_v39 = vadd.f32 %v650_v48, %v359_v10  ;;  %1746 = vtanh.f32 %v877_v43  ;;  %v371_v8 = vmul.f32 %v1719_v31, %v2520_v36  ;;  %v662_v11 = vmul.f32 %v1733_v28, %v2680_v0 }
 0x230   :  { %v1737_v4 = vpop.eup %1736  ;;  %1063 = vadd.xlane.f32.xlu2 %v1062_v60  ;;  %v686_v38 = vadd.f32 %v654_v33, %v363_v42  ;;  %1748 = vtanh.f32 %v881_v52  ;;  %v375_v45 = vmul.f32 %v1721_v18, %v2520_v36  ;;  %v666_v37 = vmul.f32 %v1735_v40, %v2680_v0 }
 0x231   :  { %v1739_v46 = vpop.eup %1738  ;;  %v694_v30 = vadd.f32 %v662_v11, %v371_v8  ;;  %1750 = vtanh.f32 %v885_v20  ;;  %v379_v19 = vmul.f32 %v1723_v35, %v2520_v36  ;;  %v670_v10 = vmul.f32 %v1737_v4, %v2680_v0 }
 0x232   :  { %v1741_v43 = vpop.eup %1740  ;;  %v821_v48 = vpop.xlane.xlu2 %820  ;;  %v698_v31 = vadd.f32 %v666_v37, %v375_v45  ;;  %1752 = vtanh.f32 %v889_v2  ;;  %v387_v28 = vmul.f32 %v1725_v59, %v2520_v36  ;;  %v678_v60 = vmul.f32 %v1739_v46, %v2680_v0 }
 0x233   :  { %v1743_v42 = vpop.eup %1742  ;;  %v897_v18 = vadd.f32 %v3058_v23, %v821_v48  ;;  %v1071_v40 = vsel %vm162_vm0, %v1017_v55, 0.0  ;;  %v1131_v52 = vsel %vm162_vm0, %v1037_v53, 0.0  ;;  %1754 = vtanh.f32 %v313_v3 }
 0x234   :  { %v1745_v20 = vpop.eup %1744  ;;  %1123 = vadd.xlane.f32.xlu1 %v1122_v63  ;;  %v3095_v35 = vpop.permute.xlu1 %938  ;;  %v658_v4 = vmul.f32 %v1743_v42, %v2680_v0  ;;  %1756 = vtanh.f32 %v606_v32  ;;  %v3098_v33 = vadd.f32 %v670_v10, %v379_v19  ;;  %v3100_v59 = vadd.f32 %v678_v60, %v387_v28 }
 0x235   :  { %v1747_v2 = vpop.eup %1746  ;;  %1758 = vtanh.f32 %v897_v18  ;;  %v1080_v8 = vsel %vm162_vm0, %v1020_v25, 0.0  ;;  %v941_v55 = vmul.f32 %v1745_v20, %v3095_v35  ;;  %v367_v53 = vmul.f32 %v1741_v43, %v2520_v36  ;;  %v3105_v11 = vpop.xlane.xlu0 %1093  ;;  %v3749_v43 = vld [vmem:[#allocation42_spill] sm:$0xff] }
 0x236   :  { %v1749_v3 = vpop.eup %1748  ;;  %v945_v63 = vmul.f32 %v1747_v2, %v3095_v35  ;;  %v944_v32 = vmul.f32 %v2929_v62, %v3095_v35  ;;  %v943_v45 = vmul.f32 %v2904_v29, %v3095_v35  ;;  %v947_v37 = vmul.f32 %v2989_v17, %v3095_v35 }
 0x237   :  { %v1751_v46 = vpop.eup %1750  ;;  %v3114_v25 = vadd.f32 %v941_v55, %v682_v39  ;;  %v690_v19 = vadd.f32 %v658_v4, %v367_v53  ;;  %v949_v10 = vmul.f32 %v1749_v3, %v3095_v35  ;;  %v901_v48 = vadd.f32 %v3058_v23, %v3749_v43 }
 0x238   :  { %v1753_v28 = vpop.eup %1752  ;;  %1072 = vadd.xlane.f32.xlu2 %v1071_v40  ;;  %v3119_v60 = vadd.f32 %v945_v63, %v686_v38  ;;  %v3122_v62 = vadd.f32 %v944_v32, %v2697_v22  ;;  %v3125_v29 = vadd.f32 %v943_v45, %v2754_v41  ;;  %v3128_v17 = vadd.f32 %v947_v37, %v2979_v26  ;;  %v3753_v32 = vld [vmem:[#allocation44_spill] sm:$0xff]  ;;  %v3754_v37 = vld [vmem:[#allocation50_spill] sm:$0xff] }
 0x239   :  { %v1755_v39 = vpop.eup %1754  ;;  %v3130_v42 = vadd.f32 %v949_v10, %v690_v19  ;;  %v952_v18 = vmul.f32 %v2936_v7, %v3095_v35  ;;  %v948_v23 = vmul.f32 %v2947_v9, %v3095_v35  ;;  %v953_v38 = vmul.f32 %v1751_v46, %v3095_v35  ;;  %v3755_v46 = vld [vmem:[#allocation45_spill] sm:$0xff] }
 0x23a   :  { %v1757_v40 = vpop.eup %1756  ;;  %v830_v22 = vpop.xlane.xlu2 %829  ;;  %v955_v41 = vmul.f32 %v2918_v50, %v3095_v35  ;;  %v951_v26 = vmul.f32 %v2907_v13, %v3095_v35  ;;  %v957_v20 = vmul.f32 %v1753_v28, %v3095_v35  ;;  %v956_v4 = vmul.f32 %v3000_v14, %v3095_v35 }
 0x23b   :  { %v1759_v2 = vpop.eup %1758  ;;  %v900_v7 = vadd.f32 %v2814_v58, %v830_v22  ;;  %v3146_v9 = vadd.f32 %v952_v18, %v2699_v54  ;;  %v3149_v55 = vadd.f32 %v948_v23, %v2701_v61  ;;  %v3151_v53 = vadd.f32 %v953_v38, %v694_v30  ;;  %v3756_v18 = vld [vmem:[#allocation43_spill] sm:$0xff] }
 0x23c   :  { %1132 = vadd.xlane.f32.xlu1 %v1131_v52  ;;  %v3154_v50 = vadd.f32 %v955_v41, %v3029_v6  ;;  %v3157_v13 = vadd.f32 %v951_v26, %v2985_v15  ;;  %v3159_v3 = vadd.f32 %v957_v20, %v698_v31  ;;  %v3162_v14 = vadd.f32 %v956_v4, %v2703_v27  ;;  %v3758_v41 = vld [vmem:[#allocation32_spill] sm:$0xff]  ;;  %v1916_v20 = vld [vmem:[%s3655_s1 + $0xa0] sm:$0xff] }
 0x23d   :  { %1760 = vtanh.f32 %v900_v7  ;;  %v959_v54 = vmul.f32 %v3056_v16, %v3095_v35  ;;  %v960_v61 = vmul.f32 %v2954_v49, %v3095_v35  ;;  %v383_v58 = vmul.f32 %v1755_v39, %v2520_v36  ;;  %v3184_v52 = vpop.xlane.xlu0 %1102 }
 0x23e   :  { %v674_v6 = vmul.f32 %v1757_v40, %v2680_v0  ;;  %v965_v30 = vmul.f32 %v1759_v2, %v3095_v35  ;;  %1762 = vtanh.f32 %v3082_v34  ;;  %v967_v15 = vmul.f32 %v2981_v5, %v3095_v35  ;;  %v3751_v5 = vld [vmem:[#allocation16_spill] sm:$0xff] }
 0x23f   :  { %v3175_v27 = vadd.f32 %v959_v54, %v3031_v21  ;;  %v3178_v31 = vadd.f32 %v960_v61, %v2705_v56  ;;  %v704_v49 = vadd.f32 %v3025_v51, %v2970_v44  ;;  %v963_v16 = vmul.f32 %v2916_v12, %v3095_v35  ;;  %v1915_v56 = vld [vmem:[%s3655_s1 + $0x88] sm:$0xff] }
 0x240   :  { %1081 = vadd.xlane.f32.xlu2 %v1080_v8  ;;  %v706_v63 = vadd.f32 %v674_v6, %v383_v58  ;;  %v3187_v34 = vadd.f32 %v967_v15, %v3036_v24  ;;  %1764 = vtanh.f32 %v901_v48  ;;  %v964_v21 = vmul.f32 %v2972_v47, %v3095_v35 }
 0x241   :  { %3750 = vst [vmem:[#allocation14_spill] sm:$0xff] %v3178_v31  ;;  %1766 = vtanh.f32 %v2922_v1  ;;  %v1023_v44 = vmul.f32 %v1915_v56, %v2593_v57  ;;  %v3196_v12 = vadd.f32 %v963_v16, %v704_v49  ;;  %v972_v51 = vmul.f32 %v3751_v5, %v3095_v35  ;;  %v3760_v56 = vld [vmem:[#allocation46_spill] sm:$0xff]  ;;  %v3761_v5 = vld [vmem:[#allocation51_spill] sm:$0xff] }
 0x242   :  { %v839_v8 = vpop.xlane.xlu2 %838  ;;  %v3200_v24 = vadd.f32 %v965_v30, %v706_v63  ;;  %v3203_v45 = vadd.f32 %v964_v21, %v3753_v32  ;;  %v680_v26 = vmul.f32 %v3758_v41, %v2680_v0  ;;  %v1026_v4 = vmul.f32 %v1916_v20, %v2593_v57  ;;  %v3759_v63 = vld [vmem:[#allocation48_spill] sm:$0xff]  ;;  %v3763_v32 = vld [vmem:[#allocation35_spill] sm:$0xff] }
 0x243   :  { %v1761_v47 = vpop.eup %1760  ;;  %v903_v1 = vadd.f32 %v3754_v37, %v839_v8  ;;  %v3207_v19 = vadd.f32 %v972_v51, %v3755_v46  ;;  %v1089_v48 = vsel %vm162_vm0, %v1023_v44, 0.0  ;;  %v3764_v37 = vld [vmem:[#allocation6_spill] sm:$0xff]  ;;  %v3765_v46 = vld [vmem:[#allocation49_spill] sm:$0xff] }
 0x244   :  { %3752 = vst [vmem:[#allocation18_spill] sm:$0xff] %v3200_v24  ;;  %v1763_v10 = vpop.eup %1762  ;;  %v968_v43 = vmul.f32 %v1761_v47, %v3095_v35  ;;  %v1098_v30 = vsel %vm162_vm0, %v1026_v4, 0.0 }
 0x245   :  { %1768 = vtanh.f32 %v903_v1  ;;  %v961_v28 = vmul.f32 %v1763_v10, %v3095_v35  ;;  %v3230_v54 = vpop.xlane.xlu0 %1111 }
 0x246   :  { %v1765_v39 = vpop.eup %1764  ;;  %v3213_v23 = vadd.f32 %v968_v43, %v3756_v18  ;;  %v3766_v43 = vld [vmem:[#allocation47_spill] sm:$0xff]  ;;  %v3768_v18 = vld [vmem:[#allocation40_spill] sm:$0xff] }
 0x247   :  { %v1767_v38 = vpop.eup %1766  ;;  %v3216_v40 = vadd.f32 %v961_v28, %v3098_v33  ;;  %v969_v22 = vmul.f32 %v1765_v39, %v3095_v35  ;;  %v3767_v28 = vld [vmem:[#allocation53_spill] sm:$0xff] }
 0x248   :  { %3757 = vst [vmem:[#allocation23_spill] sm:$0xff] %v3213_v23  ;;  %1090 = vadd.xlane.f32.xlu2 %v1089_v48  ;;  %v389_v33 = vmul.f32 %v1767_v38, %v2520_v36 }
 0x249   :  { %v3226_v2 = vadd.f32 %v969_v22, %v3100_v59  ;;  %v1917_v59 = vld [vmem:[%s3655_s1 + $0xb8] sm:$0xff]  ;;  %v1918_v22 = vld [vmem:[%s3655_s1 + $0xd0] sm:$0xff] }
 0x24a   :  { %v3228_v7 = vpop.permute.xlu2 %564  ;;  %v712_v6 = vadd.f32 %v680_v26, %v389_v33  ;;  %v1029_v49 = vmul.f32 %v1917_v59, %v2593_v57  ;;  %v1032_v41 = vmul.f32 %v1918_v22, %v2593_v57  ;;  %v1919_v59 = vld [vmem:[%s3656_s5] ss:$0 sm:$0xff] }
 0x24b   :  { %v1769_v61 = vpop.eup %1768 }
 0x24c   :  { %v971_v58 = vmul.f32 %v1769_v61, %v3095_v35  ;;  %v1107_v10 = vsel %vm162_vm0, %v1029_v49, 0.0  ;;  %v3769_v61 = vmov 3  }
 0x24d   :  { %v3244_v8 = vpop.xlane.xlu0 %1120 }
 0x24e   :  { %v3235_v15 = vadd.f32 %v971_v58, %v712_v6  ;;  %3762 = vst [vmem:[#allocation17_spill] sm:$0xff] %v3244_v8  ;;  %v1116_v58 = vsel %vm162_vm0, %v1032_v41, 0.0 }
 0x250   :  { %1099 = vadd.xlane.f32.xlu2 %v1098_v30 }
 0x252   :  { %v856_v16 = vpop.permute.xlu2 %855 }
 0x253   :  { %v874_v21 = vadd.f32 %v856_v16, %v3759_v63  ;;  %v878_v44 = vadd.f32 %v856_v16, %v3760_v56  ;;  %v882_v51 = vadd.f32 %v856_v16, %v3761_v5  ;;  %v886_v47 = vadd.f32 %v856_v16, %v3763_v32  ;;  %v3771_v32 = vld [vmem:[#allocation19_spill] sm:$0xff] }
 0x254   :  { %v894_v1 = vadd.f32 %v856_v16, %v3764_v37  ;;  %v890_v48 = vadd.f32 %v856_v16, %v3766_v43  ;;  %v902_v39 = vadd.f32 %v856_v16, %v3767_v28  ;;  %v898_v38 = vadd.f32 %v856_v16, %v3768_v18 }
 0x255   :  { %1152 = vperm.xlu1 %1619, %v3765_v46   ;;  %1770 = vtanh.f32 %v874_v21  ;;  %v3268_v49 = vpop.xlane.xlu0 %1129  ;;  %v3770_v21 = vld [vmem:[#allocation29_spill] sm:$0xff] }
 0x256   :  { %1772 = vtanh.f32 %v878_v44  ;;  %v583_v56 = vadd.f32 %v3228_v7, %v3770_v21  ;;  %v3778_v21 = vld [vmem:[#allocation38_spill] sm:$0xff] }
 0x257   :  { %1774 = vtanh.f32 %v882_v51 }
 0x258   :  { %1108 = vadd.xlane.f32.xlu2 %v1107_v10  ;;  %1776 = vtanh.f32 %v886_v47  ;;  %v587_v47 = vadd.f32 %v3228_v7, %v3771_v32  ;;  %v3772_v10 = vld [vmem:[#allocation33_spill] sm:$0xff] }
 0x259   :  { %1778 = vtanh.f32 %v894_v1  ;;  %v591_v43 = vadd.f32 %v3228_v7, %v3772_v10  ;;  %v3780_v10 = vld [vmem:[#allocation3_spill] sm:$0xff] }
 0x25a   :  { %1780 = vtanh.f32 %v890_v48  ;;  %v1920_v48 = vld [vmem:[%s3655_s1 + $0xe8] sm:$0xff] }
 0x25b   :  { %v1771_v26 = vpop.eup %1770  ;;  %1782 = vtanh.f32 %v898_v38  ;;  %v1035_v28 = vmul.f32 %v1920_v48, %v2593_v57  ;;  %v3773_v38 = vld [vmem:[#allocation22_spill] sm:$0xff]  ;;  %v3781_v48 = vld [vmem:[#allocation5_spill] sm:$0xff] }
 0x25c   :  { %v1773_v20 = vpop.eup %1772  ;;  %v3258_v4 = vmul.f32 %v1771_v26, %v3095_v35  ;;  %1784 = vtanh.f32 %v902_v39  ;;  %v595_v22 = vadd.f32 %v3228_v7, %v3773_v38  ;;  %v3774_v26 = vld [vmem:[#allocation25_spill] sm:$0xff]  ;;  %v3782_v38 = vld [vmem:[#allocation7_spill] sm:$0xff] }
 0x25d   :  { %v1775_v33 = vpop.eup %1774  ;;  %1621 = vset.pattern.permute.xlu1 %v3769_v61  ;;  %v3263_v6 = vmul.f32 %v1773_v20, %v3095_v35  ;;  %v599_v20 = vadd.f32 %v3228_v7, %v3774_v26  ;;  %1786 = vtanh.f32 %v583_v56  ;;  %v3775_v61 = vld [vmem:[#allocation26_spill] sm:$0xff] }
 0x25e   :  { %v1777_v30 = vpop.eup %1776  ;;  %1229 = vperm.xlu1 %1621, %v1919_v59   ;;  %v3271_v16 = vmul.f32 %v1775_v33, %v3095_v35  ;;  %v607_v57 = vadd.f32 %v3228_v7, %v3775_v61  ;;  %1788 = vtanh.f32 %v587_v47  ;;  %v1125_v59 = vsel %vm162_vm0, %v1035_v28, 0.0  ;;  %v3779_v47 = vld [vmem:[#allocation2_spill] sm:$0xff] }
 0x25f   :  { %v1779_v63 = vpop.eup %1778  ;;  %v3275_v44 = vpop.xlane.xlu1 %1042  ;;  %v3278_v5 = vmul.f32 %v1777_v30, %v3095_v35  ;;  %1790 = vtanh.f32 %v591_v43 }
 0x260   :  { %v1781_v51 = vpop.eup %1780  ;;  %1117 = vadd.xlane.f32.xlu2 %v1116_v58  ;;  %v3283_v37 = vmul.f32 %v1779_v63, %v3095_v35  ;;  %v3776_v58 = vld [vmem:[#allocation31_spill] sm:$0xff]  ;;  %1792 = vtanh.f32 %v595_v22  ;;  %v3777_v63 = vmov 0  }
 0x261   :  { %v1783_v1 = vpop.eup %1782  ;;  %v3292_v39 = vmul.f32 %v1781_v51, %v3095_v35  ;;  %v611_v30 = vadd.f32 %v3228_v7, %v3776_v58  ;;  %v603_v51 = vadd.f32 %v3228_v7, %v3778_v21  ;;  %1794 = vtanh.f32 %v599_v20  ;;  %v3783_v7 = vld [vmem:[#allocation10_spill] sm:$0xff] }
 0x262   :  { %v1785_v18 = vpop.eup %1784  ;;  %v3297_v41 = vmul.f32 %v1783_v1, %v3095_v35  ;;  %1796 = vtanh.f32 %v607_v57  ;;  %v3784_v57 = vld [vmem:[#allocation21_spill] sm:$0xff] }
 0x263   :  { %v3302_v33 = vmul.f32 %v1785_v18, %v3095_v35  ;;  %v1787_v32 = vpop.eup %1786  ;;  %1798 = vtanh.f32 %v611_v30  ;;  %v3785_v30 = vld [vmem:[#allocation15_spill] sm:$0xff] }
 0x264   :  { %v1789_v18 = vpop.eup %1788  ;;  %1800 = vtanh.f32 %v603_v51 }
 0x265   :  { %v1791_v26 = vpop.eup %1790 }
 0x266   :  { %1623 = vset.pattern.permute.xlu1 %v3777_v63  ;;  %v1793_v61 = vpop.eup %1792  ;;  %v659_v24 = vmul.f32 %v1791_v26, %v2680_v0 }
 0x267   :  { %v3312_v56 = vpop.xlane.xlu1 %1051 }
 0x268   :  { %v272_v35 = vpop.permute.xlu0 %271  ;;  %1126 = vadd.xlane.f32.xlu2 %v1125_v59  ;;  %v1795_v59 = vpop.eup %1794 }
 0x269   :  { %v290_v1 = vadd.f32 %v272_v35, %v3779_v47  ;;  %v294_v43 = vadd.f32 %v272_v35, %v3780_v10  ;;  %v298_v28 = vadd.f32 %v272_v35, %v3781_v48  ;;  %v302_v22 = vadd.f32 %v272_v35, %v3782_v38  ;;  %v1797_v47 = vpop.eup %1796  ;;  %v3786_v10 = vld [vmem:[#allocation12_spill] sm:$0xff] }
 0x26a   :  { %v306_v20 = vadd.f32 %v272_v35, %v3783_v7  ;;  %v314_v58 = vadd.f32 %v272_v35, %v3784_v57  ;;  %v318_v21 = vadd.f32 %v272_v35, %v3785_v30  ;;  %v310_v48 = vadd.f32 %v272_v35, %v3786_v10  ;;  %v1799_v23 = vpop.eup %1798 }
 0x26b   :  { %1802 = vtanh.f32 %v290_v1  ;;  %v1801_v51 = vpop.eup %1800 }
 0x26c   :  { %1804 = vtanh.f32 %v294_v43  ;;  %v651_v43 = vmul.f32 %v1787_v32, %v2680_v0 }
 0x26d   :  { %1806 = vtanh.f32 %v298_v28 }
 0x26e   :  { %1808 = vtanh.f32 %v302_v22  ;;  %v655_v22 = vmul.f32 %v1789_v18, %v2680_v0  ;;  %v667_v18 = vmul.f32 %v1795_v59, %v2680_v0 }
 0x26f   :  { %1810 = vtanh.f32 %v306_v20  ;;  %v3322_v38 = vpop.xlane.xlu1 %1060 }
 0x270   :  { %1812 = vtanh.f32 %v314_v58 }
 0x271   :  { %v1803_v7 = vpop.eup %1802  ;;  %1814 = vtanh.f32 %v318_v21 }
 0x272   :  { %v1805_v1 = vpop.eup %1804  ;;  %v360_v57 = vmul.f32 %v1803_v7, %v2520_v36  ;;  %1816 = vtanh.f32 %v310_v48  ;;  %v663_v7 = vmul.f32 %v1793_v61, %v2680_v0 }
 0x273   :  { %v1807_v30 = vpop.eup %1806  ;;  %v364_v28 = vmul.f32 %v1805_v1, %v2520_v36 }
 0x274   :  { %v1809_v35 = vpop.eup %1808  ;;  %v683_v10 = vadd.f32 %v651_v43, %v360_v57  ;;  %v368_v20 = vmul.f32 %v1807_v30, %v2520_v36 }
 0x275   :  { %v1811_v58 = vpop.eup %1810  ;;  %v687_v8 = vadd.f32 %v655_v22, %v364_v28  ;;  %v372_v21 = vmul.f32 %v1809_v35, %v2520_v36  ;;  %v675_v28 = vmul.f32 %v1797_v47, %v2680_v0  ;;  %v679_v35 = vmul.f32 %v1799_v23, %v2680_v0 }
 0x276   :  { %v1813_v31 = vpop.eup %1812  ;;  %v3333_v32 = vadd.f32 %v3258_v4, %v683_v10  ;;  %v691_v48 = vadd.f32 %v659_v24, %v368_v20  ;;  %v376_v1 = vmul.f32 %v1811_v58, %v2520_v36 }
 0x277   :  { %v1815_v57 = vpop.eup %1814  ;;  %v3338_v43 = vadd.f32 %v3263_v6, %v687_v8  ;;  %v695_v26 = vadd.f32 %v663_v7, %v372_v21  ;;  %v384_v30 = vmul.f32 %v1813_v31, %v2520_v36  ;;  %v3347_v10 = vpop.xlane.xlu1 %1069  ;;  %v671_v31 = vmul.f32 %v1801_v51, %v2680_v0 }
 0x278   :  { %v1817_v22 = vpop.eup %1816  ;;  %v3343_v61 = vadd.f32 %v3271_v16, %v691_v48  ;;  %v699_v4 = vadd.f32 %v667_v18, %v376_v1  ;;  %v388_v24 = vmul.f32 %v1815_v57, %v2520_v36 }
 0x279   :  { %v3350_v59 = vadd.f32 %v3278_v5, %v695_v26  ;;  %v380_v8 = vmul.f32 %v1817_v22, %v2520_v36  ;;  %v707_v6 = vadd.f32 %v675_v28, %v384_v30  ;;  %v3787_v5 = vld [vmem:[#allocation9_spill] sm:$0xff] }
 0x27a   :  { %v3355_v47 = vadd.f32 %v3292_v39, %v699_v4  ;;  %v711_v16 = vadd.f32 %v679_v35, %v388_v24 }
 0x27b   :  { %v703_v20 = vadd.f32 %v671_v31, %v380_v8  ;;  %v3358_v58 = vadd.f32 %v3297_v41, %v707_v6 }
 0x27c   :  { %v3361_v23 = vadd.f32 %v3302_v33, %v711_v16 }
 0x27d   :  { %v3364_v21 = vadd.f32 %v3283_v37, %v703_v20 }
 0x27f   :  { %v1079_v36 = vpop.xlane.xlu1 %1078 }
 0x280   :  { %1140 = vperm.xlu2 %1618, %v3765_v46  }
 0x287   :  { %v3370_v39 = vpop.xlane.xlu1 %1087 }
 0x288   :  { %1620 = vset.pattern.permute.xlu2 %v3787_v5 }
 0x28b   :  { %v3368_v0 = vpop.xlane.xlu2 %1039 }
 0x28f   :  { %v3375_v41 = vpop.xlane.xlu1 %1096 }
 0x290   :  { %1158 = vperm.xlu2 %1620, %v3765_v46   ;;  %v3386_v46 = vpop.permute.xlu0 %1146 }
 0x291   :  { %v1185_v22 = vadd.f32 %v3386_v46, %v3184_v52  ;;  %v1177_v4 = vadd.f32 %v3386_v46, %v1079_v36 }
 0x293   :  { %v3373_v51 = vpop.xlane.xlu2 %1048 }
 0x297   :  { %v1106_v37 = vpop.xlane.xlu1 %1105 }
 0x298   :  { %1622 = vset.pattern.permute.xlu2 %v3777_v63  ;;  %v1165_v63 = vadd.f32 %v3386_v46, %v3275_v44 }
 0x29a   :  { %1818 = vtanh.f32 %v1165_v63 }
 0x29b   :  { %v1055_v33 = vpop.xlane.xlu2 %1054  ;;  %1820 = vtanh.f32 %v1185_v22 }
 0x29c   :  { %v1169_v24 = vadd.f32 %v3386_v46, %v1055_v33  ;;  %1822 = vtanh.f32 %v1177_v4 }
 0x29e   :  { %1824 = vtanh.f32 %v1169_v24 }
 0x29f   :  { %v1115_v48 = vpop.xlane.xlu1 %1114 }
 0x2a0   :  { %v1189_v6 = vadd.f32 %v3386_v46, %v1115_v48  ;;  %v1819_v36 = vpop.eup %1818 }
 0x2a1   :  { %v1821_v5 = vpop.eup %1820 }
 0x2a2   :  { %v1823_v33 = vpop.eup %1822 }
 0x2a3   :  { %v3378_v7 = vpop.xlane.xlu2 %1063 }
 0x2a4   :  { %v1825_v48 = vpop.eup %1824 }
 0x2a7   :  { %v3382_v57 = vpop.xlane.xlu1 %1123 }
 0x2ab   :  { %v3380_v1 = vpop.xlane.xlu2 %1072 }
 0x2af   :  { %v3384_v30 = vpop.xlane.xlu1 %1132 }
 0x2b3   :  { %v1082_v18 = vpop.xlane.xlu2 %1081 }
 0x2bb   :  { %v1091_v26 = vpop.xlane.xlu2 %1090 }
 0x2bc   :  { %v1181_v35 = vadd.f32 %v3386_v46, %v1091_v26 }
 0x2be   :  { %1826 = vtanh.f32 %v1181_v35 }
 0x2c3   :  { %v3388_v28 = vpop.xlane.xlu2 %1099 }
 0x2c7   :  { %v3397_v8 = vpop.permute.xlu1 %1152 }
 0x2c8   :  { %v1178_v31 = vadd.f32 %v3397_v8, %v1082_v18  ;;  %v1186_v44 = vadd.f32 %v3397_v8, %v1106_v37  ;;  %v1182_v52 = vadd.f32 %v3397_v8, %v3105_v11  ;;  %v1194_v20 = vadd.f32 %v3397_v8, %v3268_v49  ;;  %v1827_v37 = vpop.eup %1826 }
 0x2ca   :  { %1828 = vtanh.f32 %v1178_v31 }
 0x2cb   :  { %v3404_v16 = vpop.xlane.xlu2 %1108  ;;  %1830 = vtanh.f32 %v1189_v6 }
 0x2cc   :  { %1832 = vtanh.f32 %v1182_v52 }
 0x2cd   :  { %1834 = vtanh.f32 %v1186_v44 }
 0x2ce   :  { %1836 = vtanh.f32 %v1194_v20 }
 0x2d0   :  { %v3408_v18 = vpop.permute.xlu1 %1229  ;;  %v1829_v63 = vpop.eup %1828 }
 0x2d1   :  { %v1233_v11 = vmul.f32 %v1819_v36, %v3408_v18  ;;  %v1237_v26 = vmul.f32 %v1825_v48, %v3408_v18  ;;  %v1245_v22 = vmul.f32 %v1823_v33, %v3408_v18  ;;  %v1253_v49 = vmul.f32 %v1821_v5, %v3408_v18  ;;  %v1831_v24 = vpop.eup %1830 }
 0x2d2   :  { %v1249_v4 = vmul.f32 %v1827_v37, %v3408_v18  ;;  %v1833_v44 = vpop.eup %1832  ;;  %v1246_v20 = vmul.f32 %v1829_v63, %v3408_v18 }
 0x2d3   :  { %v1118_v35 = vpop.xlane.xlu2 %1117  ;;  %v1265_v31 = vadd.f32 %v1233_v11, %v3333_v32  ;;  %v3417_v6 = vadd.f32 %v1237_v26, %v3338_v43  ;;  %v1835_v36 = vpop.eup %1834  ;;  %v3422_v33 = vadd.f32 %v1245_v22, %v3350_v59  ;;  %v1250_v5 = vmul.f32 %v1833_v44, %v3408_v18 }
 0x2d4   :  { %v1190_v52 = vadd.f32 %v3397_v8, %v1118_v35  ;;  %v3426_v48 = vadd.f32 %v1253_v49, %v3364_v21  ;;  %v3429_v32 = vadd.f32 %v1249_v4, %v3355_v47  ;;  %v1837_v43 = vpop.eup %1836  ;;  %v3432_v37 = vadd.f32 %v1246_v20, %v3154_v50 }
 0x2d5   :  { %1332 = vperm.xlu1 %1623, %v1265_v31   ;;  %v1257_v11 = vmul.f32 %v1831_v24, %v3408_v18  ;;  %v3436_v26 = vadd.f32 %v1250_v5, %v3175_v27  ;;  %v1254_v59 = vmul.f32 %v1835_v36, %v3408_v18  ;;  %v1262_v63 = vmul.f32 %v1837_v43, %v3408_v18  ;;  %v3789_v36 = vld [vmem:[#allocation54_spill] sm:$0xff] }
 0x2d6   :  { %1838 = vtanh.f32 %v1190_v52  ;;  %v3788_v52 = vld [vmem:[#allocation52_spill] sm:$0xff]  ;;  %v1170_v5 = vadd.f32 %v3397_v8, %v3789_v36 }
 0x2d7   :  { %v3441_v21 = vadd.f32 %v1257_v11, %v3358_v58  ;;  %v3444_v47 = vadd.f32 %v1254_v59, %v3196_v12  ;;  %v3447_v22 = vadd.f32 %v1262_v63, %v3235_v15  ;;  %v1166_v20 = vadd.f32 %v3397_v8, %v3788_v52 }
 0x2db   :  { %v1127_v50 = vpop.xlane.xlu2 %1126 }
 0x2dc   :  { %v1839_v49 = vpop.eup %1838  ;;  %v1193_v4 = vadd.f32 %v3386_v46, %v1127_v50 }
 0x2dd   :  { %v1258_v27 = vmul.f32 %v1839_v49, %v3408_v18 }
 0x2de   :  { %1840 = vtanh.f32 %v1193_v4 }
 0x2df   :  { %v3452_v24 = vadd.f32 %v1258_v27, %v3187_v34 }
 0x2e3   :  { %v3454_v35 = vpop.permute.xlu2 %1140 }
 0x2e4   :  { %v1841_v58 = vpop.eup %1840  ;;  %v1164_v12 = vadd.f32 %v3454_v35, %v3368_v0  ;;  %v1168_v15 = vadd.f32 %v3454_v35, %v3312_v56  ;;  %v1172_v31 = vadd.f32 %v3454_v35, %v3378_v7  ;;  %v1192_v34 = vadd.f32 %v3454_v35, %v3382_v57 }
 0x2e5   :  { %v1261_v44 = vmul.f32 %v1841_v58, %v3408_v18  ;;  %v1184_v56 = vadd.f32 %v3454_v35, %v3388_v28 }
 0x2e6   :  { %1842 = vtanh.f32 %v1164_v12 }
 0x2e7   :  { %1844 = vtanh.f32 %v1168_v15  ;;  %v3470_v0 = vadd.f32 %v1261_v44, %v3361_v23 }
 0x2e8   :  { %1846 = vtanh.f32 %v1172_v31 }
 0x2e9   :  { %1848 = vtanh.f32 %v1166_v20 }
 0x2ea   :  { %1850 = vtanh.f32 %v1170_v5 }
 0x2eb   :  { %v3474_v7 = vpop.permute.xlu2 %1158  ;;  %1852 = vtanh.f32 %v1184_v56  ;;  %v3791_v56 = vld [vmem:[#allocation4_spill] sm:$0xff] }
 0x2ec   :  { %v1843_v43 = vpop.eup %1842  ;;  %v1167_v11 = vadd.f32 %v3474_v7, %v3373_v51  ;;  %v1175_v57 = vadd.f32 %v3474_v7, %v3380_v1  ;;  %v3790_v51 = vld [vmem:[#allocation37_spill] sm:$0xff]  ;;  %v1187_v15 = vadd.f32 %v3474_v7, %v3404_v16  ;;  %v1171_v36 = vadd.f32 %v3474_v7, %v3322_v38 }
 0x2ed   :  { %v1845_v59 = vpop.eup %1844  ;;  %v1232_v63 = vmul.f32 %v1843_v43, %v3408_v18  ;;  %v1173_v58 = vadd.f32 %v3386_v46, %v3790_v51  ;;  %v1176_v43 = vadd.f32 %v3454_v35, %v3791_v56 }
 0x2ee   :  { %v1847_v23 = vpop.eup %1846  ;;  %v1236_v50 = vmul.f32 %v1845_v59, %v3408_v18  ;;  %1854 = vtanh.f32 %v1167_v11 }
 0x2ef   :  { %v1264_v28 = vadd.f32 %v1232_v63, %v3114_v25  ;;  %v1240_v49 = vmul.f32 %v1847_v23, %v3408_v18  ;;  %1856 = vtanh.f32 %v1175_v57  ;;  %v1849_v4 = vpop.eup %1848  ;;  %v1195_v25 = vadd.f32 %v3474_v7, %v3384_v30 }
 0x2f0   :  { %v1268_v27 = vadd.f32 %v1236_v50, %v3119_v60  ;;  %v1851_v1 = vpop.eup %1850  ;;  %v1234_v44 = vmul.f32 %v1849_v4, %v3408_v18  ;;  %1858 = vtanh.f32 %v1192_v34 }
 0x2f1   :  { %1329 = vperm.xlu2 %1622, %v1264_v28   ;;  %v1272_v12 = vadd.f32 %v1240_v49, %v3130_v42  ;;  %v1853_v31 = vpop.eup %1852  ;;  %v1238_v60 = vmul.f32 %v1851_v1, %v3408_v18  ;;  %1860 = vtanh.f32 %v1173_v58  ;;  %v1180_v49 = vadd.f32 %v3454_v35, %v3370_v39 }
 0x2f2   :  { %1341 = vperm.xlu1 %1623, %v1268_v27   ;;  %v1252_v46 = vmul.f32 %v1853_v31, %v3408_v18  ;;  %1862 = vtanh.f32 %v1187_v15  ;;  %v1266_v5 = vadd.f32 %v1234_v44, %v3125_v29  ;;  %v1188_v44 = vadd.f32 %v3454_v35, %v3230_v54 }
 0x2f3   :  { %1864 = vtanh.f32 %v1195_v25  ;;  %v1270_v11 = vadd.f32 %v1238_v60, %v3128_v17  ;;  %v1183_v25 = vadd.f32 %v3474_v7, %v3375_v41  ;;  %v3793_v41 = vld [vmem:[#allocation14_spill] sm:$0xff] }
 0x2f4   :  { %v1855_v52 = vpop.eup %1854  ;;  %v3500_v30 = vadd.f32 %v1252_v46, %v3216_v40  ;;  %1866 = vtanh.f32 %v1171_v36  ;;  %v3795_v46 = vld [vmem:[#allocation18_spill] sm:$0xff] }
 0x2f5   :  { %v1857_v20 = vpop.eup %1856  ;;  %v1235_v42 = vmul.f32 %v1855_v52, %v3408_v18  ;;  %1868 = vtanh.f32 %v1176_v43 }
 0x2f6   :  { %v1243_v16 = vmul.f32 %v1857_v20, %v3408_v18  ;;  %v1859_v59 = vpop.eup %1858 }
 0x2f7   :  { %v1267_v34 = vadd.f32 %v1235_v42, %v3122_v62  ;;  %v1861_v63 = vpop.eup %1860  ;;  %v1260_v40 = vmul.f32 %v1859_v59, %v3408_v18 }
 0x2f8   :  { %v1275_v57 = vadd.f32 %v1243_v16, %v3146_v9  ;;  %v1863_v38 = vpop.eup %1862  ;;  %v1241_v29 = vmul.f32 %v1861_v63, %v3408_v18  ;;  %v1174_v9 = vadd.f32 %v3397_v8, %v3347_v10  ;;  %v3792_v10 = vld [vmem:[#allocation11_spill] sm:$0xff] }
 0x2f9   :  { %1338 = vperm.xlu0 %1624, %v1267_v34   ;;  %1335 = vperm.xlu2 %1622, %v1266_v5   ;;  %v1865_v62 = vpop.eup %1864  ;;  %v1292_v23 = vadd.f32 %v1260_v40, %v3226_v2  ;;  %v1255_v50 = vmul.f32 %v1863_v38, %v3408_v18  ;;  %v1179_v39 = vadd.f32 %v3474_v7, %v3792_v10 }
 0x2fa   :  { %1347 = vperm.xlu1 %1623, %v1270_v11   ;;  %v1263_v17 = vmul.f32 %v1865_v62, %v3408_v18  ;;  %v1867_v27 = vpop.eup %1866  ;;  %v1273_v51 = vadd.f32 %v1241_v29, %v3343_v61  ;;  %1870 = vtanh.f32 %v1174_v9 }
 0x2fb   :  { %v1287_v28 = vadd.f32 %v1255_v50, %v3203_v45  ;;  %v1869_v58 = vpop.eup %1868  ;;  %v1239_v2 = vmul.f32 %v1867_v27, %v3408_v18  ;;  %1872 = vtanh.f32 %v1180_v49 }
 0x2fc   :  { %v3519_v4 = vadd.f32 %v1263_v17, %v3207_v19  ;;  %v1244_v45 = vmul.f32 %v1869_v58, %v3408_v18  ;;  %1874 = vtanh.f32 %v1179_v39 }
 0x2fd   :  { %v1271_v19 = vadd.f32 %v1239_v2, %v3149_v55  ;;  %1876 = vtanh.f32 %v1183_v25 }
 0x2fe   :  { %v1276_v1 = vadd.f32 %v1244_v45, %v3151_v53  ;;  %1878 = vtanh.f32 %v1188_v44 }
 0x300   :  { %v1871_v8 = vpop.eup %1870 }
 0x301   :  { %1353 = vperm.xlu0 %1624, %v1272_v12   ;;  %1344 = vperm.xlu2 %1622, %v3417_v6   ;;  %v1873_v61 = vpop.eup %1872  ;;  %v1242_v6 = vmul.f32 %v1871_v8, %v3408_v18 }
 0x302   :  { %1356 = vperm.xlu1 %1623, %v1273_v51   ;;  %v1248_v12 = vmul.f32 %v1873_v61, %v3408_v18  ;;  %v1875_v31 = vpop.eup %1874 }
 0x303   :  { %v1274_v15 = vadd.f32 %v1242_v6, %v3157_v13  ;;  %v1247_v53 = vmul.f32 %v1875_v31, %v3408_v18  ;;  %v1877_v60 = vpop.eup %1876 }
 0x304   :  { %v1280_v55 = vadd.f32 %v1248_v12, %v3159_v3  ;;  %v1251_v13 = vmul.f32 %v1877_v60, %v3408_v18  ;;  %v1879_v3 = vpop.eup %1878 }
 0x305   :  { %v1279_v52 = vadd.f32 %v1247_v53, %v3162_v14  ;;  %v1256_v54 = vmul.f32 %v1879_v3, %v3408_v18  ;;  %v3794_v14 = vld [vmem:[#allocation17_spill] sm:$0xff] }
 0x306   :  { %v1191_v35 = vadd.f32 %v3474_v7, %v3794_v14  ;;  %v3797_v7 = vlaneseq }
 0x308   :  { %1880 = vtanh.f32 %v1191_v35  ;;  %v3558_v42 = vand.u32 127, %v3797_v7 }
 0x309   :  { %1362 = vperm.xlu0 %1624, %v1275_v57   ;;  %1350 = vperm.xlu2 %1622, %v1271_v19  }
 0x30a   :  { %1365 = vperm.xlu1 %1623, %v1276_v1   ;;  %v3577_v63 = vadd.s32 4294967272, %v3558_v42 }
 0x311   :  { %1371 = vperm.xlu0 %1624, %v3432_v37   ;;  %1359 = vperm.xlu2 %1622, %v1274_v15   ;;  %v1283_v37 = vadd.f32 %v1251_v13, %v3793_v41 }
 0x312   :  { %1377 = vperm.xlu1 %1623, %v1280_v55  }
 0x319   :  { %1374 = vperm.xlu0 %1624, %v1279_v52   ;;  %1368 = vperm.xlu2 %1622, %v3422_v33   ;;  %v1288_v33 = vadd.f32 %v1256_v54, %v3795_v46 }
 0x31a   :  { %1383 = vperm.xlu1 %1623, %v3436_v26   ;;  %v1881_v26 = vpop.eup %1880 }
 0x321   :  { %1392 = vperm.xlu0 %1624, %v3426_v48   ;;  %1380 = vperm.xlu2 %1622, %v3429_v32   ;;  %v1259_v48 = vmul.f32 %v1881_v26, %v3408_v18  ;;  %v3796_v32 = vld [vmem:[#allocation23_spill] sm:$0xff] }
 0x322   :  { %1386 = vperm.xlu1 %1623, %v1283_v37  }
 0x323   :  { %v1291_v20 = vadd.f32 %v1259_v48, %v3796_v32 }
 0x329   :  { %1401 = vperm.xlu0 %1624, %v1288_v33   ;;  %1389 = vperm.xlu2 %1622, %v3500_v30  }
 0x32a   :  { %1404 = vperm.xlu1 %1623, %v3441_v21   ;;  %v3562_v21 = vadd.s32 4294967288, %v3558_v42 }
 0x331   :  { %1407 = vperm.xlu0 %1624, %v3452_v24   ;;  %1395 = vperm.xlu2 %1622, %v3444_v47  }
 0x332   :  { %1413 = vperm.xlu1 %1623, %v1292_v23  }
 0x339   :  { %1410 = vperm.xlu0 %1624, %v1291_v20   ;;  %1398 = vperm.xlu2 %1622, %v1287_v28  }
 0x33a   :  { %1419 = vperm.xlu1 %1623, %v3447_v22   ;;  %v3569_v22 = vadd.s32 4294967280, %v3558_v42 }
 0x341   :  { %1416 = vperm.xlu2 %1622, %v3470_v0  }
 0x347   :  { %v1333_v24 = vpop.permute.xlu1 %1332 }
 0x348   :  { %v1428_v47 = vperm.slane %v1333_v24, %v3562_v21 }
 0x349   :  { %1422 = vperm.xlu2 %1622, %v3519_v4  }
 0x34b   :  { %v1330_v18 = vpop.permute.xlu2 %1329 }
 0x34c   :  { %v1426_v16 = vperm.slane %v1330_v18, %v3558_v42 }
 0x34e   :  { %v1430_v36 = vsel %vm1429_vm1, %v1428_v47, %v1426_v16 }
 0x353   :  { %v1336_v30 = vpop.permute.xlu2 %1335 }
 0x354   :  { %v1432_v0 = vperm.slane %v1336_v30, %v3569_v22 }
 0x356   :  { %v1434_v34 = vsel %vm1433_vm2, %v1432_v0, %v1430_v36 }
 0x35b   :  { %v1345_v5 = vpop.permute.xlu2 %1344 }
 0x35c   :  { %v1440_v56 = vperm.slane %v1345_v5, %v3562_v21 }
 0x363   :  { %v1351_v43 = vpop.permute.xlu2 %1350 }
 0x364   :  { %v1342_v11 = vpop.permute.xlu1 %1341  ;;  %v1444_v50 = vperm.slane %v1351_v43, %v3577_v63 }
 0x365   :  { %v1439_v57 = vperm.slane %v1342_v11, %v3558_v42 }
 0x367   :  { %v1441_v59 = vsel %vm1429_vm1, %v1440_v56, %v1439_v57 }
 0x36b   :  { %v1360_v40 = vpop.permute.xlu2 %1359  ;;  %v1339_v38 = vpop.permute.xlu0 %1338 }
 0x36c   :  { %v1348_v62 = vpop.permute.xlu1 %1347  ;;  %v1436_v29 = vperm.slane %v1339_v38, %v3577_v63  ;;  %v1449_v10 = vperm.slane %v1360_v40, %v3569_v22 }
 0x36d   :  { %v1442_v23 = vperm.slane %v1348_v62, %v3569_v22 }
 0x36e   :  { %v1438_v17 = vsel %vm1437_vm3, %v1436_v29, %v1434_v34 }
 0x36f   :  { %v1443_v9 = vsel %vm1433_vm2, %v1442_v23, %v1441_v59 }
 0x370   :  { %v1445_v28 = vsel %vm1437_vm3, %v1444_v50, %v1443_v9 }
 0x371   :  { %v1489_v49 = vsel %vm1488_vm4, %v1445_v28, %v1438_v17 }
 0x373   :  { %v1369_v4 = vpop.permute.xlu2 %1368  ;;  %v1354_v27 = vpop.permute.xlu0 %1353 }
 0x374   :  { %v1357_v51 = vpop.permute.xlu1 %1356  ;;  %v1446_v2 = vperm.slane %v1354_v27, %v3558_v42  ;;  %v1454_v44 = vperm.slane %v1369_v4, %v3562_v21 }
 0x375   :  { %v1447_v58 = vperm.slane %v1357_v51, %v3562_v21 }
 0x377   :  { %v1448_v45 = vsel %vm1429_vm1, %v1447_v58, %v1446_v2 }
 0x378   :  { %v1450_v61 = vsel %vm1433_vm2, %v1449_v10, %v1448_v45 }
 0x37b   :  { %v1381_v39 = vpop.permute.xlu2 %1380  ;;  %v1363_v19 = vpop.permute.xlu0 %1362 }
 0x37c   :  { %v1366_v8 = vpop.permute.xlu1 %1365  ;;  %v1451_v1 = vperm.slane %v1363_v19, %v3577_v63  ;;  %v1461_v33 = vperm.slane %v1381_v39, %v3562_v21 }
 0x37d   :  { %v1453_v55 = vperm.slane %v1366_v8, %v3558_v42 }
 0x37e   :  { %v1452_v6 = vsel %vm1437_vm3, %v1451_v1, %v1450_v61 }
 0x37f   :  { %v1491_v12 = vsel %vm1490_vm5, %v1452_v6, %v1489_v49  ;;  %v1455_v13 = vsel %vm1429_vm1, %v1454_v44, %v1453_v55 }
 0x383   :  { %v1390_v15 = vpop.permute.xlu2 %1389  ;;  %v1372_v25 = vpop.permute.xlu0 %1371 }
 0x384   :  { %v1378_v31 = vpop.permute.xlu1 %1377  ;;  %v1456_v53 = vperm.slane %v1372_v25, %v3569_v22  ;;  %v1467_v32 = vperm.slane %v1390_v15, %v3558_v42 }
 0x385   :  { %v1460_v35 = vperm.slane %v1378_v31, %v3558_v42 }
 0x386   :  { %v1457_v37 = vsel %vm1433_vm2, %v1456_v53, %v1455_v13 }
 0x387   :  { %v1462_v24 = vsel %vm1429_vm1, %v1461_v33, %v1460_v35 }
 0x38b   :  { %v1396_v52 = vpop.permute.xlu2 %1395  ;;  %v1375_v60 = vpop.permute.xlu0 %1374 }
 0x38c   :  { %v1384_v3 = vpop.permute.xlu1 %1383  ;;  %v1458_v41 = vperm.slane %v1375_v60, %v3577_v63  ;;  %v1470_v47 = vperm.slane %v1396_v52, %v3569_v22 }
 0x38d   :  { %v1463_v46 = vperm.slane %v1384_v3, %v3569_v22 }
 0x38e   :  { %v1459_v54 = vsel %vm1437_vm3, %v1458_v41, %v1457_v37 }
 0x38f   :  { %v1493_v14 = vsel %vm1492_vm6, %v1459_v54, %v1491_v12  ;;  %v1464_v16 = vsel %vm1433_vm2, %v1463_v46, %v1462_v24 }
 0x393   :  { %v1399_v26 = vpop.permute.xlu2 %1398  ;;  %v1393_v48 = vpop.permute.xlu0 %1392 }
 0x394   :  { %v1387_v20 = vpop.permute.xlu1 %1386  ;;  %v1468_v7 = vperm.slane %v1393_v48, %v3562_v21  ;;  %v1472_v36 = vperm.slane %v1399_v26, %v3577_v63 }
 0x395   :  { %v1465_v18 = vperm.slane %v1387_v20, %v3577_v63 }
 0x396   :  { %v1469_v30 = vsel %vm1429_vm1, %v1468_v7, %v1467_v32 }
 0x397   :  { %v1466_v0 = vsel %vm1437_vm3, %v1465_v18, %v1464_v16  ;;  %v1471_v34 = vsel %vm1433_vm2, %v1470_v47, %v1469_v30 }
 0x398   :  { %v1495_v5 = vsel %vm1494_vm7, %v1466_v0, %v1493_v14  ;;  %v1473_v56 = vsel %vm1437_vm3, %v1472_v36, %v1471_v34 }
 0x399   :  { %v1497_v43 = vsel %vm1496_vm8, %v1473_v56, %v1495_v5 }
 0x39b   :  { %v1402_v11 = vpop.permute.xlu0 %1401  ;;  %v1417_v59 = vpop.permute.xlu2 %1416 }
 0x39c   :  { %v1405_v57 = vpop.permute.xlu1 %1404  ;;  %v1474_v29 = vperm.slane %v1402_v11, %v3558_v42  ;;  %v1482_v28 = vperm.slane %v1417_v59, %v3562_v21 }
 0x39d   :  { %v1475_v62 = vperm.slane %v1405_v57, %v3562_v21 }
 0x39f   :  { %v1476_v49 = vsel %vm1429_vm1, %v1475_v62, %v1474_v29 }
 0x3a3   :  { %v1408_v40 = vpop.permute.xlu0 %1407  ;;  %v1423_v17 = vpop.permute.xlu2 %1422 }
 0x3a4   :  { %v1414_v38 = vpop.permute.xlu1 %1413  ;;  %v1477_v23 = vperm.slane %v1408_v40, %v3569_v22  ;;  %v1486_v2 = vperm.slane %v1423_v17, %v3577_v63 }
 0x3a5   :  { %v1481_v50 = vperm.slane %v1414_v38, %v3558_v42 }
 0x3a6   :  { %v1478_v51 = vsel %vm1433_vm2, %v1477_v23, %v1476_v49 }
 0x3a7   :  { %v1483_v45 = vsel %vm1429_vm1, %v1482_v28, %v1481_v50 }
 0x3ab   :  { %v1411_v9 = vpop.permute.xlu0 %1410 }
 0x3ac   :  { %v1420_v4 = vpop.permute.xlu1 %1419  ;;  %v1479_v27 = vperm.slane %v1411_v9, %v3577_v63 }
 0x3ad   :  { %v1484_v58 = vperm.slane %v1420_v4, %v3569_v22 }
 0x3ae   :  { %v1480_v42 = vsel %vm1437_vm3, %v1479_v27, %v1478_v51 }
 0x3af   :  { %v1485_v10 = vsel %vm1433_vm2, %v1484_v58, %v1483_v45  ;;  %v1499_v21 = vsel %vm1498_vm9, %v1480_v42, %v1497_v43 }
 0x3b0   :  { %v1487_v39 = vsel %vm1437_vm3, %v1486_v2, %v1485_v10 }
 0x3b1   :  { %v1501_v19 = vsel %vm1500_vm10, %v1487_v39, %v1499_v21 }
 0x3b2   :  { %1503 = vxpose.xlu0.b32.start.end [1/1] (short) (narrow) %v1501_v19, 32 }
 0x456   :  { %v1519_v8 = vpop.trf.xlu0 }
 0x457   :  { %v1535_v1 = vsel %vm162_vm0, %v1519_v8, -inf }
 0x458   :  { %1536 = vmax.xlane.f32.xlu1 %v1535_v1 }
 0x45e   :  { %v1520_v61 = vpop.trf.xlu0 }
 0x45f   :  { %v1538_v22 = vsel %vm162_vm0, %v1520_v61, -inf }
 0x460   :  { %1539 = vmax.xlane.f32.xlu2 %v1538_v22 }
 0x466   :  { %v1521_v63 = vpop.trf.xlu0 }
 0x467   :  { %v1541_v6 = vsel %vm162_vm0, %v1521_v63, -inf }
 0x468   :  { %1542 = vmax.xlane.f32.xlu0 %v1541_v6 }
 0x46e   :  { %v1522_v12 = vpop.trf.xlu0 }
 0x46f   :  { %v1544_v15 = vsel %vm162_vm0, %v1522_v12, -inf }
 0x470   :  { %1545 = vmax.xlane.f32.xlu2 %v1544_v15 }
 0x4cb   :  { %v1537_v25 = vpop.xlane.xlu1 %1536 }
 0x4cc   :  { %v1547_v31 = vsub.f32 %v1519_v8, %v1537_v25 }
 0x4ce   :  { %v1551_v55 = vmul.f32 1.442695, %v1547_v31 }
 0x4d0   :  { %1882 = vpow2.f32 %v1551_v55 }
 0x4d3   :  { %v1540_v53 = vpop.xlane.xlu2 %1539 }
 0x4d4   :  { %v1548_v44 = vsub.f32 %v1520_v61, %v1540_v53 }
 0x4d6   :  { %v1883_v52 = vpop.eup %1882  ;;  %v1553_v60 = vmul.f32 1.442695, %v1548_v44 }
 0x4d7   :  { %v1559_v13 = vsel %vm162_vm0, %v1883_v52, 0.0 }
 0x4d8   :  { %1884 = vpow2.f32 %v1553_v60  ;;  %1560 = vadd.xlane.f32.xlu1 %v1559_v13 }
 0x4db   :  { %v1543_v3 = vpop.xlane.xlu0 %1542 }
 0x4dc   :  { %v1549_v41 = vsub.f32 %v1521_v63, %v1543_v3 }
 0x4de   :  { %v1885_v37 = vpop.eup %1884  ;;  %v1555_v54 = vmul.f32 1.442695, %v1549_v41 }
 0x4df   :  { %v1562_v14 = vsel %vm162_vm0, %v1885_v37, 0.0 }
 0x4e0   :  { %1886 = vpow2.f32 %v1555_v54  ;;  %1563 = vadd.xlane.f32.xlu2 %v1562_v14 }
 0x4e3   :  { %v1546_v35 = vpop.xlane.xlu2 %1545 }
 0x4e4   :  { %v1550_v46 = vsub.f32 %v1522_v12, %v1546_v35 }
 0x4e6   :  { %v1887_v33 = vpop.eup %1886  ;;  %v1557_v26 = vmul.f32 1.442695, %v1550_v46 }
 0x4e7   :  { %v1565_v48 = vsel %vm162_vm0, %v1887_v33, 0.0 }
 0x4e8   :  { %1888 = vpow2.f32 %v1557_v26  ;;  %1566 = vadd.xlane.f32.xlu1 %v1565_v48 }
 0x4ee   :  { %v1889_v32 = vpop.eup %1888 }
 0x4ef   :  { %v1568_v20 = vsel %vm162_vm0, %v1889_v32, 0.0 }
 0x4f0   :  { %1569 = vadd.xlane.f32.xlu2 %v1568_v20 }
 0x54b   :  { %v1561_v7 = vpop.xlane.xlu1 %1560 }
 0x54c   :  { %1890 = vrcp.f32 %v1561_v7 }
 0x552   :  { %v1891_v24 = vpop.eup %1890 }
 0x553   :  { %v1575_v47 = vmul.f32 %v1891_v24, %v1561_v7  ;;  %v1564_v18 = vpop.xlane.xlu2 %1563 }
 0x554   :  { %1892 = vrcp.f32 %v1564_v18 }
 0x555   :  { %v1579_v16 = vsub.f32 2.0, %v1575_v47 }
 0x557   :  { %v1583_v36 = vmul.f32 %v1891_v24, %v1579_v16 }
 0x559   :  { %v1587_v30 = vmul.f32 %v1883_v52, %v1583_v36 }
 0x55a   :  { %v1893_v0 = vpop.eup %1892 }
 0x55b   :  { %1591 = vst.msk [vmem:[%s3657_s6] sm:$0xff] %vm162_vm0, %v1587_v30  ;;  %v1576_v34 = vmul.f32 %v1893_v0, %v1564_v18  ;;  %v1567_v5 = vpop.xlane.xlu1 %1566 }
 0x55c   :  { %1894 = vrcp.f32 %v1567_v5 }
 0x55d   :  { %v1580_v56 = vsub.f32 2.0, %v1576_v34 }
 0x55f   :  { %v1584_v43 = vmul.f32 %v1893_v0, %v1580_v56 }
 0x561   :  { %v1588_v11 = vmul.f32 %v1885_v37, %v1584_v43 }
 0x562   :  { %v1895_v57 = vpop.eup %1894 }
 0x563   :  { %1592 = vst.msk [vmem:[%s3657_s6 + $0x8] sm:$0xff] %vm162_vm0, %v1588_v11  ;;  %v1577_v59 = vmul.f32 %v1895_v57, %v1567_v5  ;;  %v1570_v40 = vpop.xlane.xlu2 %1569 }
 0x564   :  { %1896 = vrcp.f32 %v1570_v40 }
 0x565   :  { %v1581_v38 = vsub.f32 2.0, %v1577_v59 }
 0x567   :  { %v1585_v62 = vmul.f32 %v1895_v57, %v1581_v38 }
 0x569   :  { %v1589_v29 = vmul.f32 %v1887_v33, %v1585_v62 }
 0x56a   :  { %v1897_v23 = vpop.eup %1896 }
 0x56b   :  { %1593 = vst.msk [vmem:[%s3657_s6 + $0x10] sm:$0xff] %vm162_vm0, %v1589_v29  ;;  %v1578_v50 = vmul.f32 %v1897_v23, %v1570_v40 }
 0x56d   :  { %v1582_v17 = vsub.f32 2.0, %v1578_v50 }
 0x56f   :  { %v1586_v9 = vmul.f32 %v1897_v23, %v1582_v17 }
 0x571   :  { %v1590_v28 = vmul.f32 %v1889_v32, %v1586_v9 }
 0x573   :  { %1594 = vst.msk [vmem:[%s3657_s6 + $0x18] sm:$0xff] %vm162_vm0, %v1590_v28 }

</bundles_post_ra>
